<compile_context>
chip_gen: v5e
topology: v5e:2x2
jax: 0.10.0
libtpu: 0.0.40
codegen_flags: <defaults>
</compile_context>

<pallas_src>
import jax
import jax.numpy as jnp
import numpy as np
from jax.experimental import pallas as pl
from jax.experimental.pallas import tpu as pltpu

_F32 = 4  # bytes


# ----------------------------------------------------------------------------- kernel
def attention_kernel(enc_ref, hid_ref, we_ref, wh_ref, beh_ref, wf_ref,
                     awe_ref, alpha_ref):
    TB, N, E = enc_ref.shape
    A = we_ref.shape[1]

    # att1 = encoder_att(encoder_out): single (TB*N, E) @ (E, A) MXU matmul.
    # The reshape is layout-preserving (no relayout copy) whenever N % 8 == 0.
    att1 = jnp.dot(enc_ref[...].reshape(TB * N, E), we_ref[...],
                   preferred_element_type=jnp.float32).reshape(TB, N, A)

    # att2 = hidden_att(hidden_out) with the fused bias (be + bh).
    att2 = jnp.dot(hid_ref[...], wh_ref[...],
                   preferred_element_type=jnp.float32) + beh_ref[...]      # (TB, A)

    # relu(att1 + att2.unsqueeze(1))
    s = jnp.maximum(att1 + att2[:, None, :], 0.0)                          # (TB, N, A)

    # full_att(...).squeeze(2): width-1 output -> lane reduction on the VPU/XLU
    # instead of a 1-wide MXU matmul.  The full_att bias adds the same constant
    # to every logit of a row, so softmax (hence alpha/awe) is invariant to it.
    logits = jnp.sum(s * wf_ref[...], axis=-1)                             # (TB, N) lane-dense

    # softmax over the region axis N (single lane-reduce per row).
    m = jnp.max(logits, axis=-1, keepdims=True)                            # (TB, 1)
    p = jnp.exp(logits - m)                                                # (TB, N)
    denom = jnp.sum(p, axis=-1, keepdims=True)                             # (TB, 1)
    r = pl.reciprocal(denom, approx=True)                                  # EUP vrcp
    r = r * (2.0 - denom * r)                                              # Newton step -> ~f32 exact
    alpha = p * r                                                          # (TB, N)
    alpha_ref[...] = alpha

    # attention_weighted_encoding = sum_N(alpha * enc), accumulated over
    # 8-sublane chunks of N so the full (TB, N, E) product temp is never
    # materialized (per-step temp VMEM stays ~independent of N).
    CH = 8
    acc = jnp.zeros((TB, E), jnp.float32)
    for c in range(0, N, CH):
        h = min(CH, N - c)
        e_chunk = enc_ref[:, c:c + h, :]                                   # (TB, h, E)
        acc = acc + jnp.sum(e_chunk * alpha[:, c:c + h, None], axis=1)
    awe_ref[...] = acc


# ----------------------------------------------------------------------------- sizing
def _round_up(x, m):
    return -(-x // m) * m


def _per_row_vmem_bytes(N, E, H, A):
    """Layout-aware VMEM bytes per batch row of a block (f32): trailing dims are
    rounded up to the (8,128) vreg tile, and the in-kernel temporaries
    (att1 / relu / weighted chunk / softmax vectors) are included."""
    e_l, a_l, n_l, h_l = (_round_up(E, 128), _round_up(A, 128),
                          _round_up(N, 128), _round_up(H, 128))
    n_s = _round_up(N, 8)
    io = 2 * (n_s * e_l + h_l + e_l + n_l)      # double-buffered enc/hid/awe/alpha blocks
    tmp = (3 * n_s * a_l                        # att1, relu(att1+att2), s*wf
           + 3 * n_l                            # logits, p, alpha
           + 2 * e_l                            # awe accumulator (+ slack)
           + 8 * e_l)                           # one (·, 8, E) enc*alpha chunk product
    return _F32 * (io + tmp)


def _fixed_vmem_bytes(E, H, A):
    """Resident (batch-independent) weights/biases, double-buffered."""
    a_l = _round_up(A, 128)
    return _F32 * 2 * ((_round_up(E, 8) + _round_up(H, 8) + 2 * 8) * a_l)


def _divisors(n):
    ds, i = set(), 1
    while i * i <= n:
        if n % i == 0:
            ds.add(i)
            ds.add(n // i)
        i += 1
    return ds


def _tpu_vmem_and_cores():
    """Physical VMEM capacity and TensorCores per chip, with conservative
    fallbacks (64 MiB / 1 core, i.e. v7x-safe) if the query is unavailable."""
    vmem = 64 * 1024 * 1024
    cores = 1
    try:
        info = pltpu.get_tpu_info()
        vmem = int(getattr(info, "vmem_capacity_bytes", vmem))
    except Exception:
        pass
    try:
        kind = jax.devices()[0].device_kind.lower()
        if "v7" in kind:
            cores = 2
    except Exception:
        pass
    return vmem, cores


def _choose_block_b(B, N, E, H, A, vmem_budget, num_cores):
    """Byte-budget batch block size."""
    per_row = _per_row_vmem_bytes(N, E, H, A)
    spendable = max(per_row, vmem_budget - _fixed_vmem_bytes(E, H, A))
    cap_vmem = spendable // per_row
    # Keep the streamed encoder block in the multi-MiB sweet spot (~8 MiB cap);
    # bigger buys almost nothing and just burns VMEM on temps.
    enc_row = _F32 * _round_up(N, 8) * _round_up(E, 128)
    cap_sweet = max(8, (8 << 20) // enc_row)
    cap = int(max(1, min(cap_vmem, cap_sweet)))

    if B <= cap:
        # Whole batch fits in one block.  On a 2-TensorCore part split into an
        # even grid of two blocks (only when the halves keep the 8-sublane rule)
        # so both cores stream/compute.
        if num_cores >= 2 and B % 16 == 0 and (B // 2) <= cap:
            return B // 2
        return B

    # Multiple blocks needed: tb must then be a multiple of 8 (sublane rule for
    # the 2-D blocked operands).  Prefer a divisor of B (no ragged block); on
    # 2-TC parts prefer an even number of grid steps.
    cap8 = max(8, (cap // 8) * 8)
    divs = sorted(d for d in _divisors(B) if d % 8 == 0 and d <= cap8)
    if divs:
        if num_cores >= 2:
            even = [d for d in divs if (B // d) % 2 == 0]
            if even:
                return even[-1]
        return divs[-1]
    # No exact divisor: largest legal tb; the final partial block is handled by
    # Pallas bounds masking (no wrapper-side jnp.pad of the whole tensor).
    return cap8


# ----------------------------------------------------------------------------- wrapper
def attention_forward(encoder_out, hidden_out, params, *, block_b=None):
    """encoder_out: (B, N, E), hidden_out: (B, H) -> (awe (B, E), alpha (B, N))."""
    B, N, E = encoder_out.shape
    H = hidden_out.shape[1]
    we, be, wh, bh, wf, bf = params   # we:(E,A) be:(1,A) wh:(H,A) bh:(1,A) wf:(A,1) bf:(1,1)
    A = we.shape[1]

    # Fold the two projection biases: relu(x@We+be + h@Wh+bh) == relu(x@We + h@Wh + (be+bh)).
    beh = (be + bh).reshape(1, A)
    # full_att weight as a lane row; its bias bf is dropped (softmax invariant).
    wf_row = wf.reshape(1, A)

    vmem_phys, num_cores = _tpu_vmem_and_cores()
    # Headroom below physical VMEM for compiler-internal scratch / spill slots:
    # v7x 64 MiB -> ~48 MiB usable; v5e/v6e 128 MiB -> ~102 MiB usable.
    usable_vmem = max(32 << 20, min(vmem_phys - (16 << 20), int(0.8 * vmem_phys)))

    tb = _choose_block_b(B, N, E, H, A, usable_vmem, num_cores) if block_b is None else block_b
    grid = (pl.cdiv(B, tb),)

    awe, alpha = pl.pallas_call(
        attention_kernel,
        out_shape=(jax.ShapeDtypeStruct((B, E), jnp.float32),
                   jax.ShapeDtypeStruct((B, N), jnp.float32)),
        grid_spec=pltpu.PrefetchScalarGridSpec(
            num_scalar_prefetch=0,
            grid=grid,
            in_specs=[
                pl.BlockSpec((tb, N, E), lambda b: (b, 0, 0)),   # encoder_out block (streamed)
                pl.BlockSpec((tb, H), lambda b: (b, 0)),         # hidden_out block
                pl.BlockSpec((E, A), lambda b: (0, 0)),          # We (resident)
                pl.BlockSpec((H, A), lambda b: (0, 0)),          # Wh (resident)
                pl.BlockSpec((1, A), lambda b: (0, 0)),          # fused bias be+bh
                pl.BlockSpec((1, A), lambda b: (0, 0)),          # Wf as a row
            ],
            out_specs=[
                pl.BlockSpec((tb, E), lambda b: (b, 0)),         # attention_weighted_encoding
                pl.BlockSpec((tb, N), lambda b: (b, 0)),         # alpha
            ],
        ),
        compiler_params=pltpu.CompilerParams(
            dimension_semantics=("parallel",),
            vmem_limit_bytes=int(usable_vmem),
        ),
    )(encoder_out, hidden_out, we, wh, beh, wf_row)

    return awe, alpha


# ----------------------------------------------------------------------------- reference / test
def init_params(key, encoder_size, hidden_size, attention_size):
    """Deterministic synthetic Linear params; stored pre-transposed (in, out)."""
    k = jax.random.split(key, 6)
    we = jax.random.normal(k[0], (encoder_size, attention_size), jnp.float32) * 0.1
    be = jax.random.normal(k[1], (1, attention_size), jnp.float32) * 0.1
    wh = jax.random.normal(k[2], (hidden_size, attention_size), jnp.float32) * 0.1
    bh = jax.random.normal(k[3], (1, attention_size), jnp.float32) * 0.1
    wf = jax.random.normal(k[4], (attention_size, 1), jnp.float32) * 0.1
    bf = jax.random.normal(k[5], (1, 1), jnp.float32) * 0.1
    return we, be, wh, bh, wf, bf


def reference_forward(encoder_out, hidden_out, params):
    we, be, wh, bh, wf, bf = params
    att1 = encoder_out @ we + be                                           # (B, N, A)
    att2 = hidden_out @ wh + bh                                            # (B, A)
    att = (jnp.maximum(att1 + att2[:, None, :], 0.0) @ wf + bf)[..., 0]    # (B, N)
    alpha = jax.nn.softmax(att, axis=1)
    awe = jnp.sum(encoder_out * alpha[..., None], axis=1)
    return awe, alpha


if __name__ == "__main__":
    # (B, N, E, H, A) = (batch, regions, encoder_size, hidden_size, attention_size)
    configs = [
        dict(B=16, N=16, E=64, H=32, A=32, block_b=None),  # auto block size
        dict(B=10, N=8,  E=48, H=24, A=20, block_b=None),  # non-multiple-of-8 batch, single block (no padding)
        dict(B=40, N=24, E=64, H=32, A=48, block_b=8),     # explicit tb=8 -> 5-step pipelined grid
    ]

    key = jax.random.PRNGKey(0)
    for cfg in configs:
        B, N, E, H, A = cfg["B"], cfg["N"], cfg["E"], cfg["H"], cfg["A"]
        key, k_enc, k_hid, k_par = jax.random.split(key, 4)
        encoder_out = jax.random.normal(k_enc, (B, N, E), jnp.float32)
        hidden_out = jax.random.normal(k_hid, (B, H), jnp.float32)
        params = init_params(k_par, E, H, A)

        awe, alpha = attention_forward(encoder_out, hidden_out, params, block_b=cfg["block_b"])
        jax.block_until_ready((awe, alpha))

        awe_ref, alpha_ref = reference_forward(encoder_out, hidden_out, params)
        np.testing.assert_allclose(np.asarray(alpha), np.asarray(alpha_ref), rtol=1e-4, atol=1e-5)
        np.testing.assert_allclose(np.asarray(awe), np.asarray(awe_ref), rtol=1e-4, atol=1e-5)

    print("KERNEL_OK")
</pallas_src>

<mosaic_0001>
module attributes {stable_mosaic.version = 11 : i64} {
  func.func @attention_kernel(%arg0: i32, %arg1: memref<16x16x64xf32, #tpu.memory_space<vmem>>, %arg2: memref<16x32xf32, #tpu.memory_space<vmem>>, %arg3: memref<64x32xf32, #tpu.memory_space<vmem>>, %arg4: memref<32x32xf32, #tpu.memory_space<vmem>>, %arg5: memref<1x32xf32, #tpu.memory_space<vmem>>, %arg6: memref<1x32xf32, #tpu.memory_space<vmem>>, %arg7: memref<16x64xf32, #tpu.memory_space<vmem>>, %arg8: memref<16x16xf32, #tpu.memory_space<vmem>>) attributes {dimension_semantics = [#tpu.dimension_semantics<parallel>], iteration_bounds = array<i64: 1>, scalar_prefetch = 0 : i64, scratch_operands = 0 : i64, tpu.core_type = #tpu.core_type<tc>, window_params = [{transform_indices = @transform_0, window_bounds = array<i64: 16, 16, 64>}, {transform_indices = @transform_1, window_bounds = array<i64: 16, 32>}, {pipeline_mode = #tpu.pipeline_mode<synchronous>, transform_indices = @transform_2, window_bounds = array<i64: 64, 32>}, {pipeline_mode = #tpu.pipeline_mode<synchronous>, transform_indices = @transform_3, window_bounds = array<i64: 32, 32>}, {pipeline_mode = #tpu.pipeline_mode<synchronous>, transform_indices = @transform_4, window_bounds = array<i64: 1, 32>}, {pipeline_mode = #tpu.pipeline_mode<synchronous>, transform_indices = @transform_5, window_bounds = array<i64: 1, 32>}, {transform_indices = @transform_6, window_bounds = array<i64: 16, 64>}, {transform_indices = @transform_7, window_bounds = array<i64: 16, 16>}]} {
    %c0 = arith.constant 0 : index
    %c0_0 = arith.constant 0 : index
    %c0_1 = arith.constant 0 : index
    %0 = vector.load %arg1[%c0, %c0_0, %c0_1] : memref<16x16x64xf32, #tpu.memory_space<vmem>>, vector<16x16x64xf32>
    %1 = vector.shape_cast %0 : vector<16x16x64xf32> to vector<256x64xf32>
    %c0_2 = arith.constant 0 : index
    %c0_3 = arith.constant 0 : index
    %2 = vector.load %arg3[%c0_2, %c0_3] : memref<64x32xf32, #tpu.memory_space<vmem>>, vector<64x32xf32>
    %cst = arith.constant dense<0.000000e+00> : vector<256x32xf32>
    %3 = tpu.matmul %1, %2, %cst {dimension_numbers = #tpu.dot_dimension_numbers<[1], [0], [0], [1], [0, 0, 1, 1], [], []>} : vector<256x64xf32>, vector<64x32xf32>, vector<256x32xf32> -> vector<256x32xf32>
    %4 = vector.shape_cast %3 : vector<256x32xf32> to vector<16x16x32xf32>
    %c0_4 = arith.constant 0 : index
    %c0_5 = arith.constant 0 : index
    %5 = vector.load %arg2[%c0_4, %c0_5] : memref<16x32xf32, #tpu.memory_space<vmem>>, vector<16x32xf32>
    %c0_6 = arith.constant 0 : index
    %c0_7 = arith.constant 0 : index
    %6 = vector.load %arg4[%c0_6, %c0_7] : memref<32x32xf32, #tpu.memory_space<vmem>>, vector<32x32xf32>
    %cst_8 = arith.constant dense<0.000000e+00> : vector<16x32xf32>
    %7 = tpu.matmul %5, %6, %cst_8 {dimension_numbers = #tpu.dot_dimension_numbers<[1], [0], [0], [1], [0, 0, 1, 1], [], []>} : vector<16x32xf32>, vector<32x32xf32>, vector<16x32xf32> -> vector<16x32xf32>
    %c0_9 = arith.constant 0 : index
    %c0_10 = arith.constant 0 : index
    %8 = vector.load %arg5[%c0_9, %c0_10] : memref<1x32xf32, #tpu.memory_space<vmem>>, vector<1x32xf32>
    %9 = vector.broadcast %8 : vector<1x32xf32> to vector<16x32xf32>
    %10 = arith.addf %7, %9 : vector<16x32xf32>
    %11 = vector.shape_cast %10 : vector<16x32xf32> to vector<16x1x32xf32>
    %12 = vector.broadcast %11 : vector<16x1x32xf32> to vector<16x16x32xf32>
    %13 = arith.addf %4, %12 : vector<16x16x32xf32>
    %cst_11 = arith.constant 0.000000e+00 : f32
    %14 = vector.broadcast %cst_11 : f32 to vector<16x16x32xf32>
    %15 = arith.maximumf %13, %14 : vector<16x16x32xf32>
    %c0_12 = arith.constant 0 : index
    %c0_13 = arith.constant 0 : index
    %16 = vector.load %arg6[%c0_12, %c0_13] : memref<1x32xf32, #tpu.memory_space<vmem>>, vector<1x32xf32>
    %17 = vector.shape_cast %16 : vector<1x32xf32> to vector<1x1x32xf32>
    %18 = vector.broadcast %17 : vector<1x1x32xf32> to vector<16x16x32xf32>
    %19 = arith.mulf %15, %18 : vector<16x16x32xf32>
    %cst_14 = arith.constant dense<0.000000e+00> : vector<16x16xf32>
    %20 = vector.multi_reduction <add>, %19, %cst_14 [2] : vector<16x16x32xf32> to vector<16x16xf32>
    %cst_15 = arith.constant dense<0xFF800000> : vector<16xf32>
    %21 = vector.multi_reduction <maximumf>, %20, %cst_15 [1] : vector<16x16xf32> to vector<16xf32>
    %22 = vector.shape_cast %21 : vector<16xf32> to vector<16x1xf32>
    %23 = vector.broadcast %22 : vector<16x1xf32> to vector<16x16xf32>
    %24 = arith.subf %20, %23 : vector<16x16xf32>
    %25 = math.exp %24 : vector<16x16xf32>
    %cst_16 = arith.constant dense<0.000000e+00> : vector<16xf32>
    %26 = vector.multi_reduction <add>, %25, %cst_16 [1] : vector<16x16xf32> to vector<16xf32>
    %27 = vector.shape_cast %26 : vector<16xf32> to vector<16x1xf32>
    %28 = tpu.reciprocal %27 {approx = true} : vector<16x1xf32> -> vector<16x1xf32>
    %29 = arith.mulf %27, %28 : vector<16x1xf32>
    %cst_17 = arith.constant 2.000000e+00 : f32
    %30 = vector.broadcast %cst_17 : f32 to vector<16x1xf32>
    %31 = arith.subf %30, %29 : vector<16x1xf32>
    %32 = arith.mulf %28, %31 : vector<16x1xf32>
    %33 = vector.broadcast %32 : vector<16x1xf32> to vector<16x16xf32>
    %34 = arith.mulf %25, %33 : vector<16x16xf32>
    %c0_18 = arith.constant 0 : index
    %c0_19 = arith.constant 0 : index
    %35 = vector.load %arg8[%c0_18, %c0_19] : memref<16x16xf32, #tpu.memory_space<vmem>>, vector<16x16xf32>
    tpu.vector_store %arg8[%c0_18, %c0_19], %34 {strides = array<i32>} : memref<16x16xf32, #tpu.memory_space<vmem>>, vector<16x16xf32>,
    %cst_20 = arith.constant 0.000000e+00 : f32
    %36 = vector.broadcast %cst_20 : f32 to vector<16x64xf32>
    %c0_21 = arith.constant 0 : index
    %c0_22 = arith.constant 0 : index
    %c0_23 = arith.constant 0 : index
    %37 = vector.load %arg1[%c0_21, %c0_22, %c0_23] : memref<16x16x64xf32, #tpu.memory_space<vmem>>, vector<16x8x64xf32>
    %38 = vector.extract_strided_slice %34 {offsets = [0, 0], sizes = [16, 8], strides = [1, 1]} : vector<16x16xf32> to vector<16x8xf32>
    %39 = vector.shape_cast %38 : vector<16x8xf32> to vector<16x8x1xf32>
    %40 = vector.broadcast %39 : vector<16x8x1xf32> to vector<16x8x64xf32>
    %41 = arith.mulf %37, %40 : vector<16x8x64xf32>
    %cst_24 = arith.constant dense<0.000000e+00> : vector<16x64xf32>
    %42 = vector.multi_reduction <add>, %41, %cst_24 [1] : vector<16x8x64xf32> to vector<16x64xf32>
    %43 = arith.addf %36, %42 : vector<16x64xf32>
    %c0_25 = arith.constant 0 : index
    %c8 = arith.constant 8 : index
    %c0_26 = arith.constant 0 : index
    %44 = vector.load %arg1[%c0_25, %c8, %c0_26] : memref<16x16x64xf32, #tpu.memory_space<vmem>>, vector<16x8x64xf32>
    %45 = vector.extract_strided_slice %34 {offsets = [0, 8], sizes = [16, 8], strides = [1, 1]} : vector<16x16xf32> to vector<16x8xf32>
    %46 = vector.shape_cast %45 : vector<16x8xf32> to vector<16x8x1xf32>
    %47 = vector.broadcast %46 : vector<16x8x1xf32> to vector<16x8x64xf32>
    %48 = arith.mulf %44, %47 : vector<16x8x64xf32>
    %cst_27 = arith.constant dense<0.000000e+00> : vector<16x64xf32>
    %49 = vector.multi_reduction <add>, %48, %cst_27 [1] : vector<16x8x64xf32> to vector<16x64xf32>
    %50 = arith.addf %43, %49 : vector<16x64xf32>
    %c0_28 = arith.constant 0 : index
    %c0_29 = arith.constant 0 : index
    %51 = vector.load %arg7[%c0_28, %c0_29] : memref<16x64xf32, #tpu.memory_space<vmem>>, vector<16x64xf32>
    tpu.vector_store %arg7[%c0_28, %c0_29], %50 {strides = array<i32>} : memref<16x64xf32, #tpu.memory_space<vmem>>, vector<16x64xf32>,
    return
  }
  func.func @transform_0(%arg0: i32) -> (i32, i32, i32) {
    %c0_i32 = arith.constant 0 : i32
    %c0_i32_0 = arith.constant 0 : i32
    %c0_i32_1 = arith.constant 0 : i32
    return %arg0, %c0_i32, %c0_i32_0 : i32, i32, i32
  }
  func.func @transform_1(%arg0: i32) -> (i32, i32) {
    %c0_i32 = arith.constant 0 : i32
    %c0_i32_0 = arith.constant 0 : i32
    return %arg0, %c0_i32 : i32, i32
  }
  func.func @transform_2(%arg0: i32) -> (i32, i32) {
    %c0_i32 = arith.constant 0 : i32
    %c0_i32_0 = arith.constant 0 : i32
    %c0_i32_1 = arith.constant 0 : i32
    return %c0_i32, %c0_i32_0 : i32, i32
  }
  func.func @transform_3(%arg0: i32) -> (i32, i32) {
    %c0_i32 = arith.constant 0 : i32
    %c0_i32_0 = arith.constant 0 : i32
    %c0_i32_1 = arith.constant 0 : i32
    return %c0_i32, %c0_i32_0 : i32, i32
  }
  func.func @transform_4(%arg0: i32) -> (i32, i32) {
    %c0_i32 = arith.constant 0 : i32
    %c0_i32_0 = arith.constant 0 : i32
    %c0_i32_1 = arith.constant 0 : i32
    return %c0_i32, %c0_i32_0 : i32, i32
  }
  func.func @transform_5(%arg0: i32) -> (i32, i32) {
    %c0_i32 = arith.constant 0 : i32
    %c0_i32_0 = arith.constant 0 : i32
    %c0_i32_1 = arith.constant 0 : i32
    return %c0_i32, %c0_i32_0 : i32, i32
  }
  func.func @transform_6(%arg0: i32) -> (i32, i32) {
    %c0_i32 = arith.constant 0 : i32
    %c0_i32_0 = arith.constant 0 : i32
    return %arg0, %c0_i32 : i32, i32
  }
  func.func @transform_7(%arg0: i32) -> (i32, i32) {
    %c0_i32 = arith.constant 0 : i32
    %c0_i32_0 = arith.constant 0 : i32
    return %arg0, %c0_i32 : i32, i32
  }
}

</mosaic_0001>

<bundles_post_ra>
// kernel: tpu_custom_call.1
= control target key start
LH: loop header
LB: loop body
LE: loop exit
PB: predicated region body
PF: predicated region fallthrough
CT: control target
= control target key end

     0   :  { %13 = vsyncpa [#allocation3], 0  ;;  %s2867_s0 = inlined_call_operand.hbm [shape: f32[16,16,64], index: 0, kind: input, shape index: {}]   ;;  %s2868_s1 = inlined_call_operand.vmem [shape: f32[16,32], index: 1, kind: input, shape index: {}]   ;;  %s2869_s2 = inlined_call_operand.vmem [shape: f32[64,32], index: 2, kind: input, shape index: {}]   ;;  %s2870_s3 = inlined_call_operand.vmem [shape: f32[32,32], index: 3, kind: input, shape index: {}]   ;;  %s2871_s4 = inlined_call_operand.vmem [shape: f32[1,32], index: 4, kind: input, shape index: {}]   ;;  %s2872_s5 = inlined_call_operand.vmem [shape: f32[1,32], index: 5, kind: input, shape index: {}]   ;;  %s2873_s6 = inlined_call_operand.hbm [shape: f32[16,64], index: 6, kind: output, shape index: {0}]   ;;  %s2874_s7 = inlined_call_operand.hbm [shape: f32[16,16], index: 7, kind: output, shape index: {1}]  }
   0x1   :  { %14 = vsyncpa [#allocation4], 0 }
   0x2   :  { %15 = vsyncpa [#allocation7], 0  ;;  %s20_s26 = sshll.u32 %s2867_s0, 4  ;;  %s1925_s27 = smov [#allocation2]   ;;  %s21_s26 = int_to_ptr.hbm [resolvable:$true] %s20_s26 }
   0x3   :  { %s22_s28 = sshll.u32 %s1925_s27, 4  ;;  %s1926_s29 = smov 128   ;;  %s23_s28 = int_to_ptr.vmem [resolvable:$true] %s22_s28 }
   0x4   :  { %s1927_s30 = smov 8  }
   0x5   :  { %28 = dma.hbm_to_vmem [thread:$0]  %s21_s26, 4096, %s23_s28, [#allocation3], %s1926_s29, %s1926_s29, %s1927_s30  }
   0x6   :  { %1919 = dma.done.wait [#allocation3], 4096  }
   0x7   :  { %1920 = vsyncadd [#allocation3], 4294963200  ;;  %v82_v0 = vld [vmem:[%s2869_s2 + $0x38] sm:$0xff]  ;;  %v81_v1 = vld [vmem:[%s2869_s2 + $0x30] sm:$0xff]  ;;  %vm83_vm0 = vcmask 523264   ;;  %vm303_vm1 = vcmask 261120  }
   0x8   :  { %188 = vmatpush.msra.mxu0 %v82_v0  ;;  %1744 = vmatpush.msra.mxu1 %v82_v0  ;;  %v80_v2 = vld [vmem:[%s2869_s2 + $0x28] sm:$0xff]  ;;  %v79_v3 = vld [vmem:[%s2869_s2 + $0x20] sm:$0xff]  ;;  %v78_v4 = vld [vmem:[%s2869_s2 + $0x18] sm:$0xff]  ;;  %vm614_vm2 = vcmask 130112   ;;  %vm661_vm3 = vcmask 1041409   ;;  %vm663_vm4 = vcmask 1042434  }
   0x9   :  { %1745 = vmatpush.msra.mxu2 %v82_v0  ;;  %1746 = vmatpush.msra.mxu3 %v82_v0  ;;  %v77_v5 = vld [vmem:[%s2869_s2 + $0x10] sm:$0xff]  ;;  %v76_v6 = vld [vmem:[%s2869_s2 + $0x8] sm:$0xff]  ;;  %v75_v7 = vld [vmem:[%s2869_s2] sm:$0xff]  ;;  %vm665_vm5 = vcmask 1043459   ;;  %vm667_vm6 = vcmask 1044484   ;;  %vm669_vm7 = vcmask 1045509  }
   0xa   :  { %189 = vmatpush.msra.mxu0 %v81_v1  ;;  %1747 = vmatpush.msra.mxu1 %v81_v1  ;;  %v43_v8 = vld [vmem:[#allocation2] sm:$0xff]  ;;  %v298_v10 = vld [vmem:[%s2870_s3 + $0x18] sm:$0xff]  ;;  %v297_v11 = vld [vmem:[%s2870_s3 + $0x10] sm:$0xff]  ;;  %vm671_vm8 = vcmask 1046534   ;;  %vm673_vm9 = vcmask 1047559   ;;  %vm684_vm10 = vcmask 130048  }
   0xb   :  { %1748 = vmatpush.msra.mxu2 %v81_v1  ;;  %1749 = vmatpush.msra.mxu3 %v81_v1  ;;  %v51_v9 = vld [vmem:[#allocation2 + $0x40] sm:$0xff]  ;;  %v57_v12 = vld [vmem:[#allocation2 + $0x70] sm:$0xff]  ;;  %v66_v13 = vld [vmem:[#allocation2 + $0xb8] sm:$0xff]  ;;  %s1692_s16 = sshll.u32 %s2874_s7, 4  ;;  %s1930_s7 = smov [#allocation5]   ;;  %s1693_s16 = int_to_ptr.hbm [resolvable:$true] %s1692_s16 }
   0xc   :  { %190 = vmatpush.msra.mxu0 %v80_v2  ;;  %1750 = vmatpush.msra.mxu1 %v80_v2  ;;  %v296_v14 = vld [vmem:[%s2870_s3 + $0x8] sm:$0xff]  ;;  %v295_v15 = vld [vmem:[%s2870_s3] sm:$0xff]  ;;  %v58_v18 = vld [vmem:[#allocation2 + $0x78] sm:$0xff]  ;;  %s1677_s17 = sshll.u32 %s1930_s7, 4  ;;  %s1679_s20 = sshll.u32 %s2873_s6, 4  ;;  %s1678_s17 = int_to_ptr.vmem [resolvable:$true] %s1677_s17  ;;  %s1680_s20 = int_to_ptr.hbm [resolvable:$true] %s1679_s20 }
   0xd   :  { %1751 = vmatpush.msra.mxu2 %v80_v2  ;;  %1752 = vmatpush.msra.mxu3 %v80_v2  ;;  %v44_v16 = vld [vmem:[#allocation2 + $0x8] sm:$0xff]  ;;  %v67_v19 = vld [vmem:[#allocation2 + $0xc0] sm:$0xff]  ;;  %v45_v20 = vld [vmem:[#allocation2 + $0x10] sm:$0xff] }
   0xe   :  { %191 = vmatpush.msra.mxu0 %v79_v3  ;;  %1753 = vmatpush.msra.mxu1 %v79_v3  ;;  %v52_v17 = vld [vmem:[#allocation2 + $0x48] sm:$0xff]  ;;  %v53_v21 = vld [vmem:[#allocation2 + $0x50] sm:$0xff]  ;;  %v59_v22 = vld [vmem:[#allocation2 + $0x80] sm:$0xff] }
   0xf   :  { %1754 = vmatpush.msra.mxu2 %v79_v3  ;;  %1755 = vmatpush.msra.mxu3 %v79_v3  ;;  %v68_v23 = vld [vmem:[#allocation2 + $0xc8] sm:$0xff]  ;;  %v46_v24 = vld [vmem:[#allocation2 + $0x18] sm:$0xff]  ;;  %v69_v27 = vld [vmem:[#allocation2 + $0xd0] sm:$0xff] }
  0x10   :  { %192 = vmatpush.msra.mxu0 %v78_v4  ;;  %1756 = vmatpush.msra.mxu1 %v78_v4  ;;  %v54_v25 = vld [vmem:[#allocation2 + $0x58] sm:$0xff]  ;;  %v60_v26 = vld [vmem:[#allocation2 + $0x88] sm:$0xff]  ;;  %v47_v28 = vld [vmem:[#allocation2 + $0x20] sm:$0xff] }
  0x11   :  { %1757 = vmatpush.msra.mxu2 %v78_v4  ;;  %1758 = vmatpush.msra.mxu3 %v78_v4  ;;  %v55_v29 = vld [vmem:[#allocation2 + $0x60] sm:$0xff]  ;;  %v61_v30 = vld [vmem:[#allocation2 + $0x90] sm:$0xff]  ;;  %v70_v31 = vld [vmem:[#allocation2 + $0xd8] sm:$0xff] }
  0x12   :  { %193 = vmatpush.msra.mxu0 %v77_v5  ;;  %1759 = vmatpush.msra.mxu1 %v77_v5  ;;  %v48_v32 = vld [vmem:[#allocation2 + $0x28] sm:$0xff]  ;;  %v62_v34 = vld [vmem:[#allocation2 + $0x98] sm:$0xff]  ;;  %v71_v35 = vld [vmem:[#allocation2 + $0xe0] sm:$0xff] }
  0x13   :  { %1760 = vmatpush.msra.mxu2 %v77_v5  ;;  %1761 = vmatpush.msra.mxu3 %v77_v5  ;;  %v56_v33 = vld [vmem:[#allocation2 + $0x68] sm:$0xff]  ;;  %v49_v36 = vld [vmem:[#allocation2 + $0x30] sm:$0xff]  ;;  %v293_v37 = vld [vmem:[%s2868_s1] sm:$0xff] }
  0x14   :  { %194 = vmatpush.msra.mxu0 %v76_v6  ;;  %1762 = vmatpush.msra.mxu1 %v76_v6  ;;  %v63_v38 = vld [vmem:[#allocation2 + $0xa0] sm:$0xff]  ;;  %v72_v39 = vld [vmem:[#allocation2 + $0xe8] sm:$0xff]  ;;  %v50_v40 = vld [vmem:[#allocation2 + $0x38] sm:$0xff] }
  0x15   :  { %1763 = vmatpush.msra.mxu2 %v76_v6  ;;  %1764 = vmatpush.msra.mxu3 %v76_v6  ;;  %v294_v41 = vld [vmem:[%s2868_s1 + $0x8] sm:$0xff]  ;;  %v73_v43 = vld [vmem:[#allocation2 + $0xf0] sm:$0xff]  ;;  %v74_v45 = vld [vmem:[#allocation2 + $0xf8] sm:$0xff] }
  0x16   :  { %195 = vmatpush.msra.mxu0 %v75_v7  ;;  %1765 = vmatpush.msra.mxu1 %v75_v7  ;;  %v64_v42 = vld [vmem:[#allocation2 + $0xa8] sm:$0xff]  ;;  %v65_v44 = vld [vmem:[#allocation2 + $0xb0] sm:$0xff]  ;;  %v2068_v59 = vld [vmem:[%s2871_s4] ss:$0 sm:$0xff]  ;;  %s1929_s4 = smov [#allocation6]  }
  0x17   :  { %1710 = vmatmul.msk.f32.vlgmr.msra.gmra.mxu0 %vm83_vm0, %v43_v8  ;;  %1718 = vmatmul.msk.f32.vlgmr.msra.gmra.mxu1 %vm83_vm0, %v51_v9  ;;  %v2083_v5 = vld [vmem:[%s2872_s5] ss:$0 sm:$0xff]  ;;  %s2829_s5 = sshll.u32 %s1929_s4, 4  ;;  %s1691_s5 = int_to_ptr.vmem [resolvable:$true] %s2829_s5 }
  0x18   :  { %322 = vmatpush.msrb.mxu1 %v298_v10  ;;  %1766 = vmatpush.msra.mxu2 %v75_v7 }
  0x19   :  { %1767 = vmatpush.msra.mxu3 %v75_v7  ;;  %1724 = vmatmul.msk.f32.vlgmr.msra.gmra.mxu2 %vm83_vm0, %v57_v12 }
  0x1a   :  { %323 = vmatpush.msrb.mxu1 %v297_v11  ;;  %1733 = vmatmul.msk.f32.vlgmr.msra.gmra.mxu3 %vm83_vm0, %v66_v13 }
  0x1c   :  { %324 = vmatpush.msrb.mxu1 %v296_v14 }
  0x1e   :  { %325 = vmatpush.msrb.mxu1 %v295_v15 }
  0x1f   :  { %1711 = vmatmul.msk.f32.gmra.mxu0 %vm83_vm0, %v44_v16  ;;  %1719 = vmatmul.msk.f32.gmra.mxu1 %vm83_vm0, %v52_v17 }
  0x21   :  { %1725 = vmatmul.msk.f32.gmra.mxu2 %vm83_vm0, %v58_v18 }
  0x22   :  { %1734 = vmatmul.msk.f32.gmra.mxu3 %vm83_vm0, %v67_v19 }
  0x27   :  { %1712 = vmatmul.msk.f32.gmra.mxu0 %vm83_vm0, %v45_v20  ;;  %1720 = vmatmul.msk.f32.gmra.mxu1 %vm83_vm0, %v53_v21 }
  0x29   :  { %1726 = vmatmul.msk.f32.gmra.mxu2 %vm83_vm0, %v59_v22 }
  0x2a   :  { %1735 = vmatmul.msk.f32.gmra.mxu3 %vm83_vm0, %v68_v23 }
  0x2f   :  { %1713 = vmatmul.msk.f32.gmra.mxu0 %vm83_vm0, %v46_v24  ;;  %1721 = vmatmul.msk.f32.gmra.mxu1 %vm83_vm0, %v54_v25 }
  0x31   :  { %1727 = vmatmul.msk.f32.gmra.mxu2 %vm83_vm0, %v60_v26 }
  0x32   :  { %1736 = vmatmul.msk.f32.gmra.mxu3 %vm83_vm0, %v69_v27 }
  0x37   :  { %1714 = vmatmul.msk.f32.gmra.mxu0 %vm83_vm0, %v47_v28  ;;  %1722 = vmatmul.msk.f32.gmra.mxu1 %vm83_vm0, %v55_v29 }
  0x39   :  { %1728 = vmatmul.msk.f32.gmra.mxu2 %vm83_vm0, %v61_v30 }
  0x3a   :  { %1737 = vmatmul.msk.f32.gmra.mxu3 %vm83_vm0, %v70_v31 }
  0x3f   :  { %1715 = vmatmul.msk.f32.gmra.mxu0 %vm83_vm0, %v48_v32  ;;  %1723 = vmatmul.msk.f32.gmra.mxu1 %vm83_vm0, %v56_v33 }
  0x41   :  { %1729 = vmatmul.msk.f32.gmra.mxu2 %vm83_vm0, %v62_v34 }
  0x42   :  { %1738 = vmatmul.msk.f32.gmra.mxu3 %vm83_vm0, %v71_v35 }
  0x47   :  { %1716 = vmatmul.msk.f32.gmra.mxu0 %vm83_vm0, %v49_v36  ;;  %1742 = vmatmul.msk.f32.vlgmr.msrb.gmra.mxu1 %vm303_vm1, %v293_v37 }
  0x49   :  { %1730 = vmatmul.msk.f32.gmra.mxu2 %vm83_vm0, %v63_v38 }
  0x4a   :  { %1739 = vmatmul.msk.f32.gmra.mxu3 %vm83_vm0, %v72_v39 }
  0x4f   :  { %1717 = vmatmul.msk.f32.gmra.mxu0 %vm83_vm0, %v50_v40  ;;  %1743 = vmatmul.msk.f32.gmra.mxu1 %vm303_vm1, %v294_v41 }
  0x51   :  { %1731 = vmatmul.msk.f32.gmra.mxu2 %vm83_vm0, %v64_v42 }
  0x52   :  { %1740 = vmatmul.msk.f32.gmra.mxu3 %vm83_vm0, %v73_v43 }
  0x59   :  { %1732 = vmatmul.msk.f32.gmra.mxu2 %vm83_vm0, %v65_v44 }
  0x5a   :  { %1741 = vmatmul.msk.f32.gmra.mxu3 %vm83_vm0, %v74_v45 }
  0x94   :  { %v221_v46 = vpop.f32.mrf.mxu1  ;;  %v197_v47 = vpop.f32.mrf.mxu0 }
  0x9c   :  { %v2053_v48 = vpop.f32.mrf.mxu1  ;;  %v200_v49 = vpop.f32.mrf.mxu0 }
  0x9d   :  { %v2057_v53 = vpop.f32.mrf.mxu2  ;;  %v2070_v60 = vpop.f32.mrf.mxu3 }
  0xa4   :  { %v227_v50 = vpop.f32.mrf.mxu1  ;;  %v203_v51 = vpop.f32.mrf.mxu0 }
  0xa5   :  { %v2063_v57 = vpop.f32.mrf.mxu2  ;;  %v2086_v13 = vpop.f32.mrf.mxu3 }
  0xac   :  { %v2055_v52 = vpop.f32.mrf.mxu1  ;;  %v206_v54 = vpop.f32.mrf.mxu0 }
  0xad   :  { %v2075_v63 = vpop.f32.mrf.mxu2  ;;  %v2102_v41 = vpop.f32.mrf.mxu3 }
  0xb4   :  { %v2059_v55 = vpop.f32.mrf.mxu1  ;;  %v209_v58 = vpop.f32.mrf.mxu0 }
  0xb5   :  { %v2094_v26 = vpop.f32.mrf.mxu2 }
  0xbc   :  { %v2061_v56 = vpop.f32.mrf.mxu1  ;;  %v212_v2 = vpop.f32.mrf.mxu0 }
  0xc4   :  { %v327_v61 = vpop.f32.mrf.mxu1  ;;  %v215_v29 = vpop.f32.mrf.mxu0 }
  0xc5   :  { %v2073_v62 = vadd.f32 %v2068_v59, %v327_v61 }
  0xc7   :  { %v349_v0 = vperm.slane %v2073_v62, 0  ;;  %v335_v1 = vrot.slane %v2073_v62, 1  ;;  %v336_v3 = vrot.slane %v2073_v62, 2  ;;  %v337_v8 = vrot.slane %v2073_v62, 3 }
  0xc8   :  { %v339_v16 = vrot.slane %v2073_v62, 5  ;;  %v338_v20 = vrot.slane %v2073_v62, 4  ;;  %v340_v40 = vrot.slane %v2073_v62, 6 }
  0xc9   :  { %v381_v4 = vadd.f32 %v349_v0, %v197_v47  ;;  %v350_v6 = vperm.slane %v335_v1, 0  ;;  %v351_v7 = vperm.slane %v336_v3, 0  ;;  %v382_v10 = vadd.f32 %v349_v0, %v200_v49  ;;  %v251_v47 = vpop.f32.mrf.mxu2 }
  0xca   :  { %v352_v21 = vperm.slane %v337_v8, 0  ;;  %v354_v28 = vperm.slane %v339_v16, 0  ;;  %v353_v33 = vperm.slane %v338_v20, 0 }
  0xcb   :  { %v413_v9 = vmax.f32 %v381_v4, 0.0  ;;  %v383_v11 = vadd.f32 %v350_v6, %v203_v51  ;;  %v385_v12 = vadd.f32 %v351_v7, %v209_v58  ;;  %v384_v15 = vadd.f32 %v350_v6, %v206_v54 }
  0xcc   :  { %v386_v19 = vadd.f32 %v351_v7, %v212_v2  ;;  %v414_v23 = vmax.f32 %v382_v10, 0.0  ;;  %v387_v34 = vadd.f32 %v352_v21, %v215_v29  ;;  %v391_v38 = vadd.f32 %v354_v28, %v227_v50  ;;  %v2115_v7 = vpop.f32.mrf.mxu3  ;;  %v218_v8 = vpop.f32.mrf.mxu0 }
  0xcd   :  { %v449_v14 = vmul.f32 %v2083_v5, %v413_v9  ;;  %v415_v17 = vmax.f32 %v383_v11, 0.0  ;;  %v417_v18 = vmax.f32 %v385_v12, 0.0  ;;  %v416_v27 = vmax.f32 %v384_v15, 0.0  ;;  %v330_v11 = vpop.f32.mrf.mxu1 }
  0xce   :  { %v418_v32 = vmax.f32 %v386_v19, 0.0  ;;  %v450_v35 = vmul.f32 %v2083_v5, %v414_v23  ;;  %v389_v39 = vadd.f32 %v353_v33, %v221_v46  ;;  %v419_v43 = vmax.f32 %v387_v34, 0.0 }
  0xcf   :  { %v481_v22 = vsel %vm303_vm1, %v449_v14, 0.0  ;;  %v451_v24 = vmul.f32 %v2083_v5, %v415_v17  ;;  %v453_v25 = vmul.f32 %v2083_v5, %v417_v18  ;;  %v452_v36 = vmul.f32 %v2083_v5, %v416_v27 }
  0xd0   :  { %482 = vadd.xlane.f32.xlu0 %v481_v22  ;;  %v454_v37 = vmul.f32 %v2083_v5, %v418_v32  ;;  %v484_v42 = vsel %vm303_vm1, %v450_v35, 0.0  ;;  %v423_v49 = vmax.f32 %v391_v38, 0.0  ;;  %v421_v51 = vmax.f32 %v389_v39, 0.0 }
  0xd1   :  { %v487_v30 = vsel %vm303_vm1, %v451_v24, 0.0  ;;  %v493_v31 = vsel %vm303_vm1, %v453_v25, 0.0  ;;  %v490_v44 = vsel %vm303_vm1, %v452_v36, 0.0  ;;  %v355_v54 = vperm.slane %v340_v40, 0  ;;  %v254_v12 = vpop.f32.mrf.mxu2 }
  0xd2   :  { %488 = vadd.xlane.f32.xlu1 %v487_v30  ;;  %494 = vadd.xlane.f32.xlu2 %v493_v31  ;;  %v496_v45 = vsel %vm303_vm1, %v454_v37, 0.0  ;;  %v455_v46 = vmul.f32 %v2083_v5, %v419_v43  ;;  %v390_v50 = vadd.f32 %v353_v33, %v2053_v48  ;;  %v341_v58 = vrot.slane %v2073_v62, 7 }
  0xd3   :  { %v459_v61 = vmul.f32 %v2083_v5, %v423_v49  ;;  %v457_v0 = vmul.f32 %v2083_v5, %v421_v51  ;;  %v394_v1 = vadd.f32 %v355_v54, %v2061_v56  ;;  %v392_v2 = vadd.f32 %v354_v28, %v2055_v52 }
  0xd4   :  { %v499_v3 = vsel %vm303_vm1, %v455_v46, 0.0  ;;  %v422_v4 = vmax.f32 %v390_v50, 0.0  ;;  %v356_v6 = vperm.slane %v341_v58, 0  ;;  %v393_v52 = vadd.f32 %v355_v54, %v2059_v55  ;;  %v2133_v27 = vpop.f32.mrf.mxu3 }
  0xd5   :  { %v511_v48 = vsel %vm303_vm1, %v459_v61, 0.0  ;;  %v505_v62 = vsel %vm303_vm1, %v457_v0, 0.0  ;;  %v426_v9 = vmax.f32 %v394_v1, 0.0  ;;  %v424_v10 = vmax.f32 %v392_v2, 0.0 }
  0xd6   :  { %v458_v56 = vmul.f32 %v2083_v5, %v422_v4  ;;  %v388_v14 = vadd.f32 %v352_v21, %v218_v8  ;;  %v395_v15 = vadd.f32 %v356_v6, %v2057_v53  ;;  %v2125_v18 = vadd.f32 %v2068_v59, %v330_v11 }
  0xd7   :  { %v462_v16 = vmul.f32 %v2083_v5, %v426_v9  ;;  %v460_v17 = vmul.f32 %v2083_v5, %v424_v10  ;;  %v425_v20 = vmax.f32 %v393_v52, 0.0  ;;  %v396_v25 = vadd.f32 %v356_v6, %v2063_v57 }
  0xd8   :  { %485 = vadd.xlane.f32.xlu0 %v484_v42  ;;  %v508_v19 = vsel %vm303_vm1, %v458_v56, 0.0  ;;  %v420_v22 = vmax.f32 %v388_v14, 0.0  ;;  %v342_v23 = vrot.slane %v2125_v18, 1  ;;  %v427_v24 = vmax.f32 %v395_v15, 0.0 }
  0xd9   :  { %v520_v55 = vsel %vm303_vm1, %v462_v16, 0.0  ;;  %v514_v21 = vsel %vm303_vm1, %v460_v17, 0.0  ;;  %v357_v53 = vperm.slane %v2125_v18, 0  ;;  %v461_v59 = vmul.f32 %v2083_v5, %v425_v20  ;;  %v257_v30 = vpop.f32.mrf.mxu2 }
  0xda   :  { %491 = vadd.xlane.f32.xlu1 %v490_v44  ;;  %497 = vadd.xlane.f32.xlu2 %v496_v45  ;;  %v343_v28 = vrot.slane %v2125_v18, 2  ;;  %v358_v29 = vperm.slane %v342_v23, 0  ;;  %v463_v31 = vmul.f32 %v2083_v5, %v427_v24  ;;  %v456_v32 = vmul.f32 %v2083_v5, %v420_v22 }
  0xdb   :  { %v398_v33 = vadd.f32 %v357_v53, %v2094_v26  ;;  %v397_v34 = vadd.f32 %v357_v53, %v2075_v63  ;;  %v428_v35 = vmax.f32 %v396_v25, 0.0  ;;  %v517_v57 = vsel %vm303_vm1, %v461_v59, 0.0 }
  0xdc   :  { %v359_v36 = vperm.slane %v343_v28, 0  ;;  %v399_v37 = vadd.f32 %v358_v29, %v251_v47  ;;  %v523_v38 = vsel %vm303_vm1, %v463_v31, 0.0  ;;  %v502_v39 = vsel %vm303_vm1, %v456_v32, 0.0  ;;  %v281_v45 = vpop.f32.mrf.mxu3 }
  0xdd   :  { %v430_v40 = vmax.f32 %v398_v33, 0.0  ;;  %v429_v42 = vmax.f32 %v397_v34, 0.0  ;;  %v464_v43 = vmul.f32 %v2083_v5, %v428_v35  ;;  %v400_v44 = vadd.f32 %v358_v29, %v254_v12 }
  0xde   :  { %v401_v26 = vadd.f32 %v359_v36, %v257_v30  ;;  %v431_v63 = vmax.f32 %v399_v37, 0.0  ;;  %v344_v47 = vrot.slane %v2125_v18, 3  ;;  %v345_v61 = vrot.slane %v2125_v18, 4 }
  0xdf   :  { %v466_v49 = vmul.f32 %v2083_v5, %v430_v40  ;;  %v465_v51 = vmul.f32 %v2083_v5, %v429_v42  ;;  %v526_v54 = vsel %vm303_vm1, %v464_v43, 0.0  ;;  %v432_v46 = vmax.f32 %v400_v44, 0.0 }
  0xe0   :  { %500 = vadd.xlane.f32.xlu0 %v499_v3  ;;  %v433_v50 = vmax.f32 %v401_v26, 0.0  ;;  %v467_v1 = vmul.f32 %v2083_v5, %v431_v63  ;;  %v360_v4 = vperm.slane %v344_v47, 0  ;;  %v347_v10 = vrot.slane %v2125_v18, 6 }
  0xe1   :  { %v260_v58 = vpop.f32.mrf.mxu2  ;;  %v532_v2 = vsel %vm303_vm1, %v466_v49, 0.0  ;;  %v529_v3 = vsel %vm303_vm1, %v465_v51, 0.0  ;;  %v468_v8 = vmul.f32 %v2083_v5, %v432_v46  ;;  %v346_v11 = vrot.slane %v2125_v18, 5 }
  0xe2   :  { %512 = vadd.xlane.f32.xlu1 %v511_v48  ;;  %506 = vadd.xlane.f32.xlu2 %v505_v62  ;;  %v402_v0 = vadd.f32 %v359_v36, %v260_v58  ;;  %v469_v6 = vmul.f32 %v2083_v5, %v433_v50  ;;  %v361_v48 = vperm.slane %v345_v61, 0  ;;  %v535_v9 = vsel %vm303_vm1, %v467_v1, 0.0 }
  0xe3   :  { %v404_v56 = vadd.f32 %v360_v4, %v2070_v60  ;;  %v538_v15 = vsel %vm303_vm1, %v468_v8, 0.0  ;;  %v363_v17 = vperm.slane %v347_v10, 0  ;;  %v362_v22 = vperm.slane %v346_v11, 0 }
  0xe4   :  { %v434_v62 = vmax.f32 %v402_v0, 0.0  ;;  %v406_v52 = vadd.f32 %v361_v48, %v2102_v41  ;;  %v284_v12 = vpop.f32.mrf.mxu3  ;;  %v541_v14 = vsel %vm303_vm1, %v469_v6, 0.0  ;;  %v405_v60 = vadd.f32 %v361_v48, %v2086_v13 }
  0xe5   :  { %v409_v23 = vadd.f32 %v363_v17, %v281_v45  ;;  %v407_v24 = vadd.f32 %v362_v22, %v2115_v7  ;;  %v348_v13 = vrot.slane %v2125_v18, 7  ;;  %v408_v33 = vadd.f32 %v362_v22, %v2133_v27 }
  0xe6   :  { %v470_v16 = vmul.f32 %v2083_v5, %v434_v62  ;;  %v438_v20 = vmax.f32 %v406_v52, 0.0  ;;  %v437_v53 = vmax.f32 %v405_v60, 0.0  ;;  %v410_v34 = vadd.f32 %v363_v17, %v284_v12 }
  0xe7   :  { %v441_v59 = vmax.f32 %v409_v23, 0.0  ;;  %v439_v30 = vmax.f32 %v407_v24, 0.0  ;;  %v364_v36 = vperm.slane %v348_v13, 0 }
  0xe8   :  { %509 = vadd.xlane.f32.xlu0 %v508_v19  ;;  %v436_v19 = vmax.f32 %v404_v56, 0.0  ;;  %v544_v41 = vsel %vm303_vm1, %v470_v16, 0.0  ;;  %v473_v32 = vmul.f32 %v2083_v5, %v437_v53 }
  0xe9   :  { %v263_v31 = vpop.f32.mrf.mxu2  ;;  %v475_v35 = vmul.f32 %v2083_v5, %v439_v30 }
  0xea   :  { %521 = vadd.xlane.f32.xlu1 %v520_v55  ;;  %515 = vadd.xlane.f32.xlu2 %v514_v21  ;;  %v472_v55 = vmul.f32 %v2083_v5, %v436_v19  ;;  %v474_v21 = vmul.f32 %v2083_v5, %v438_v20  ;;  %v403_v7 = vadd.f32 %v360_v4, %v263_v31  ;;  %v553_v37 = vsel %vm303_vm1, %v473_v32, 0.0 }
  0xeb   :  { %v559_v40 = vsel %vm303_vm1, %v475_v35, 0.0 }
  0xec   :  { %v287_v25 = vpop.f32.mrf.mxu3  ;;  %v550_v28 = vsel %vm303_vm1, %v472_v55, 0.0  ;;  %v556_v29 = vsel %vm303_vm1, %v474_v21, 0.0  ;;  %v435_v18 = vmax.f32 %v403_v7, 0.0 }
  0xed   :  { %v411_v43 = vadd.f32 %v364_v36, %v287_v25 }
  0xee   :  { %v471_v63 = vmul.f32 %v2083_v5, %v435_v18 }
  0xef   :  { %v443_v49 = vmax.f32 %v411_v43, 0.0 }
  0xf0   :  { %518 = vadd.xlane.f32.xlu0 %v517_v57  ;;  %v477_v57 = vmul.f32 %v2083_v5, %v441_v59  ;;  %v547_v46 = vsel %vm303_vm1, %v471_v63, 0.0 }
  0xf1   :  { %v479_v50 = vmul.f32 %v2083_v5, %v443_v49 }
  0xf2   :  { %524 = vadd.xlane.f32.xlu2 %v523_v38  ;;  %503 = vadd.xlane.f32.xlu1 %v502_v39  ;;  %v440_v38 = vmax.f32 %v408_v33, 0.0  ;;  %v442_v39 = vmax.f32 %v410_v34, 0.0  ;;  %v565_v42 = vsel %vm303_vm1, %v477_v57, 0.0 }
  0xf3   :  { %v571_v61 = vsel %vm303_vm1, %v479_v50, 0.0 }
  0xf4   :  { %v290_v44 = vpop.f32.mrf.mxu3  ;;  %v476_v27 = vmul.f32 %v2083_v5, %v440_v38  ;;  %v478_v45 = vmul.f32 %v2083_v5, %v442_v39 }
  0xf5   :  { %v412_v26 = vadd.f32 %v364_v36, %v290_v44 }
  0xf6   :  { %v562_v51 = vsel %vm303_vm1, %v476_v27, 0.0 }
  0xf7   :  { %v444_v47 = vmax.f32 %v412_v26, 0.0 }
  0xf8   :  { %527 = vadd.xlane.f32.xlu0 %v526_v54  ;;  %v568_v54 = vsel %vm303_vm1, %v478_v45, 0.0 }
  0xf9   :  { %v480_v58 = vmul.f32 %v2083_v5, %v444_v47 }
  0xfa   :  { %533 = vadd.xlane.f32.xlu2 %v532_v2  ;;  %530 = vadd.xlane.f32.xlu1 %v529_v3 }
  0xfb   :  { %v574_v0 = vsel %vm303_vm1, %v480_v58, 0.0 }
 0x100   :  { %536 = vadd.xlane.f32.xlu0 %v535_v9  ;;  %v609_v9 = vlaneseq }
 0x102   :  { %542 = vadd.xlane.f32.xlu2 %v541_v14  ;;  %539 = vadd.xlane.f32.xlu1 %v538_v15  ;;  %v2206_v10 = vand.u32 127, %v609_v9 }
 0x104   :  { %v2211_v52 = vadd.s32 4294967288, %v2206_v10 }
 0x108   :  { %545 = vadd.xlane.f32.xlu0 %v544_v41 }
 0x10a   :  { %551 = vadd.xlane.f32.xlu2 %v550_v28  ;;  %557 = vadd.xlane.f32.xlu1 %v556_v29 }
 0x110   :  { %554 = vadd.xlane.f32.xlu0 %v553_v37 }
 0x112   :  { %560 = vadd.xlane.f32.xlu2 %v559_v40  ;;  %566 = vadd.xlane.f32.xlu1 %v565_v42 }
 0x118   :  { %563 = vadd.xlane.f32.xlu0 %v562_v51 }
 0x11a   :  { %569 = vadd.xlane.f32.xlu2 %v568_v54  ;;  %548 = vadd.xlane.f32.xlu1 %v547_v46 }
 0x120   :  { %572 = vadd.xlane.f32.xlu0 %v571_v61 }
 0x122   :  { %575 = vadd.xlane.f32.xlu1 %v574_v0 }
 0x143   :  { %v2188_v1 = vpop.xlane.xlu0 %482 }
 0x144   :  { %v611_v19 = vperm.slane %v2188_v1, %v2206_v10 }
 0x145   :  { %v2190_v2 = vpop.xlane.xlu1 %488  ;;  %v2192_v3 = vpop.xlane.xlu2 %494 }
 0x146   :  { %v616_v15 = vperm.slane %v2190_v2, %v2206_v10  ;;  %v619_v60 = vperm.slane %v2192_v3, %v2206_v10 }
 0x14b   :  { %v2194_v4 = vpop.xlane.xlu0 %485 }
 0x14c   :  { %v613_v16 = vperm.slane %v2194_v4, %v2211_v52 }
 0x14d   :  { %v2196_v6 = vpop.xlane.xlu1 %491  ;;  %v2198_v8 = vpop.xlane.xlu2 %497 }
 0x14e   :  { %v617_v14 = vperm.slane %v2196_v6, %v2211_v52  ;;  %v620_v17 = vperm.slane %v2198_v8, %v2211_v52  ;;  %v615_v41 = vsel %vm614_vm2, %v613_v16, %v611_v19 }
 0x150   :  { %v618_v20 = vsel %vm614_vm2, %v617_v14, %v616_v15  ;;  %v621_v55 = vsel %vm614_vm2, %v620_v17, %v619_v60 }
 0x151   :  { %v662_v23 = vsel %vm661_vm3, %v618_v20, %v615_v41 }
 0x152   :  { %v664_v30 = vsel %vm663_vm4, %v621_v55, %v662_v23 }
 0x153   :  { %v2200_v48 = vpop.xlane.xlu0 %500 }
 0x154   :  { %v622_v25 = vperm.slane %v2200_v48, %v2206_v10 }
 0x155   :  { %v2202_v5 = vpop.xlane.xlu1 %512  ;;  %v2204_v62 = vpop.xlane.xlu2 %506 }
 0x156   :  { %v625_v29 = vperm.slane %v2204_v62, %v2206_v10  ;;  %v628_v13 = vperm.slane %v2202_v5, %v2206_v10 }
 0x15b   :  { %v2208_v56 = vpop.xlane.xlu0 %509 }
 0x15c   :  { %v626_v21 = vperm.slane %v2208_v56, %v2211_v52 }
 0x15d   :  { %v2213_v11 = vpop.xlane.xlu1 %521  ;;  %v2215_v12 = vpop.xlane.xlu2 %515 }
 0x15e   :  { %v629_v59 = vperm.slane %v2215_v12, %v2211_v52  ;;  %v627_v33 = vsel %vm614_vm2, %v626_v21, %v625_v29  ;;  %v632_v7 = vperm.slane %v2213_v11, %v2211_v52 }
 0x160   :  { %v630_v35 = vsel %vm614_vm2, %v629_v59, %v628_v13 }
 0x163   :  { %v2228_v22 = vpop.xlane.xlu0 %518 }
 0x164   :  { %v631_v31 = vperm.slane %v2228_v22, %v2206_v10 }
 0x165   :  { %v2237_v24 = vpop.xlane.xlu2 %524  ;;  %v2239_v53 = vpop.xlane.xlu1 %503 }
 0x166   :  { %v623_v28 = vperm.slane %v2239_v53, %v2211_v52  ;;  %v634_v37 = vperm.slane %v2237_v24, %v2206_v10  ;;  %v633_v18 = vsel %vm614_vm2, %v632_v7, %v631_v31 }
 0x168   :  { %v624_v32 = vsel %vm614_vm2, %v623_v28, %v622_v25 }
 0x169   :  { %v666_v34 = vsel %vm665_vm5, %v624_v32, %v664_v30 }
 0x16a   :  { %v668_v36 = vsel %vm667_vm6, %v627_v33, %v666_v34 }
 0x16b   :  { %v2260_v57 = vpop.xlane.xlu0 %527  ;;  %v670_v39 = vsel %vm669_vm7, %v630_v35, %v668_v36 }
 0x16c   :  { %v635_v38 = vperm.slane %v2260_v57, %v2211_v52  ;;  %v672_v44 = vsel %vm671_vm8, %v633_v18, %v670_v39 }
 0x16d   :  { %v2269_v40 = vpop.xlane.xlu2 %533  ;;  %v2271_v42 = vpop.xlane.xlu1 %530 }
 0x16e   :  { %v636_v43 = vsel %vm614_vm2, %v635_v38, %v634_v37  ;;  %v638_v14 = vperm.slane %v2269_v40, %v2211_v52  ;;  %v637_v15 = vperm.slane %v2271_v42, %v2206_v10 }
 0x16f   :  { %v674_v27 = vsel %vm673_vm9, %v636_v43, %v672_v44 }
 0x170   :  { %v685_v26 = vsel %vm684_vm10, %v674_v27, -inf  ;;  %v639_v23 = vsel %vm614_vm2, %v638_v14, %v637_v15 }
 0x171   :  { %686 = vmax.xlane.f32.xlu2 %v685_v26 }
 0x173   :  { %v2277_v45 = vpop.xlane.xlu0 %536 }
 0x174   :  { %v640_v16 = vperm.slane %v2277_v45, %v2206_v10 }
 0x175   :  { %v2279_v63 = vpop.xlane.xlu2 %542  ;;  %v2281_v49 = vpop.xlane.xlu1 %539 }
 0x176   :  { %v641_v61 = vperm.slane %v2281_v49, %v2211_v52  ;;  %v643_v0 = vperm.slane %v2279_v63, %v2206_v10 }
 0x178   :  { %v642_v19 = vsel %vm614_vm2, %v641_v61, %v640_v16 }
 0x179   :  { %v675_v25 = vsel %vm661_vm3, %v642_v19, %v639_v23 }
 0x17b   :  { %v2283_v51 = vpop.xlane.xlu0 %545 }
 0x17c   :  { %v644_v9 = vperm.slane %v2283_v51, %v2211_v52 }
 0x17d   :  { %v2285_v47 = vpop.xlane.xlu2 %551  ;;  %v2287_v54 = vpop.xlane.xlu1 %557 }
 0x17e   :  { %v645_v20 = vsel %vm614_vm2, %v644_v9, %v643_v0  ;;  %v647_v55 = vperm.slane %v2285_v47, %v2211_v52  ;;  %v650_v59 = vperm.slane %v2287_v54, %v2211_v52  ;;  %v1928_v9 = vmov 0  }
 0x17f   :  { %v676_v28 = vsel %vm663_vm4, %v645_v20, %v675_v25  ;;  %1776 = vset.pattern.permute.xlu0 %v1928_v9  ;;  %1775 = vset.pattern.permute.xlu2 %v1928_v9 }
 0x180   :  { %1774 = vset.pattern.permute.xlu1 %v1928_v9 }
 0x183   :  { %v2289_v46 = vpop.xlane.xlu0 %554 }
 0x184   :  { %v649_v60 = vperm.slane %v2289_v46, %v2206_v10 }
 0x185   :  { %v2291_v50 = vpop.xlane.xlu1 %566  ;;  %v2293_v58 = vpop.xlane.xlu2 %560 }
 0x186   :  { %v651_v31 = vsel %vm614_vm2, %v650_v59, %v649_v60  ;;  %v652_v33 = vperm.slane %v2293_v58, %v2206_v10  ;;  %v655_v37 = vperm.slane %v2291_v50, %v2206_v10 }
 0x18b   :  { %v2307_v17 = vpop.xlane.xlu0 %563 }
 0x18c   :  { %v653_v29 = vperm.slane %v2307_v17, %v2211_v52 }
 0x18d   :  { %v2313_v41 = vpop.xlane.xlu1 %548  ;;  %v2326_v30 = vpop.xlane.xlu2 %569 }
 0x18e   :  { %v646_v21 = vperm.slane %v2313_v41, %v2206_v10  ;;  %v656_v7 = vperm.slane %v2326_v30, %v2211_v52  ;;  %v654_v36 = vsel %vm614_vm2, %v653_v29, %v652_v33 }
 0x190   :  { %v648_v13 = vsel %vm614_vm2, %v647_v55, %v646_v21  ;;  %v657_v44 = vsel %vm614_vm2, %v656_v7, %v655_v37 }
 0x191   :  { %v677_v32 = vsel %vm665_vm5, %v648_v13, %v676_v28 }
 0x192   :  { %v678_v34 = vsel %vm667_vm6, %v651_v31, %v677_v32 }
 0x193   :  { %v2336_v35 = vpop.xlane.xlu0 %572  ;;  %v679_v39 = vsel %vm669_vm7, %v654_v36, %v678_v34 }
 0x194   :  { %v658_v18 = vperm.slane %v2336_v35, %v2206_v10  ;;  %v680_v26 = vsel %vm671_vm8, %v657_v44, %v679_v39 }
 0x195   :  { %v2341_v38 = vpop.xlane.xlu1 %575 }
 0x196   :  { %v659_v43 = vperm.slane %v2341_v38, %v2211_v52 }
 0x198   :  { %v660_v27 = vsel %vm614_vm2, %v659_v43, %v658_v18 }
 0x199   :  { %v681_v61 = vsel %vm673_vm9, %v660_v27, %v680_v26 }
 0x19a   :  { %v688_v0 = vsel %vm684_vm10, %v681_v61, -inf }
 0x19b   :  { %689 = vmax.xlane.f32.xlu0 %v688_v0 }
 0x1e4   :  { %v2353_v14 = vpop.xlane.xlu2 %686 }
 0x1e5   :  { %v693_v15 = vperm.slane %v2353_v14, 0  ;;  %v694_v16 = vperm.slane %v2353_v14, 1  ;;  %v695_v23 = vperm.slane %v2353_v14, 2  ;;  %v697_v55 = vperm.slane %v2353_v14, 4 }
 0x1e6   :  { %v699_v33 = vperm.slane %v2353_v14, 6  ;;  %v700_v43 = vperm.slane %v2353_v14, 7  ;;  %v698_v61 = vperm.slane %v2353_v14, 5 }
 0x1e7   :  { %v726_v19 = vsub.f32 %v2194_v4, %v693_v15  ;;  %v725_v20 = vsub.f32 %v2188_v1, %v693_v15  ;;  %v727_v60 = vsub.f32 %v2190_v2, %v694_v16  ;;  %v728_v28 = vsub.f32 %v2196_v6, %v694_v16 }
 0x1e8   :  { %v729_v29 = vsub.f32 %v2192_v3, %v695_v23  ;;  %v734_v4 = vsub.f32 %v2208_v56, %v697_v55  ;;  %v696_v2 = vperm.slane %v2353_v14, 3  ;;  %v730_v3 = vsub.f32 %v2198_v8, %v695_v23 }
 0x1e9   :  { %v759_v21 = vmul.f32 1.442695, %v726_v19  ;;  %v757_v25 = vmul.f32 1.442695, %v725_v20  ;;  %v761_v59 = vmul.f32 1.442695, %v727_v60  ;;  %v737_v7 = vsub.f32 %v2228_v22, %v699_v33 }
 0x1ea   :  { %v763_v13 = vmul.f32 1.442695, %v728_v28  ;;  %v765_v1 = vmul.f32 1.442695, %v729_v29  ;;  %v775_v32 = vmul.f32 1.442695, %v734_v4  ;;  %v731_v56 = vsub.f32 %v2200_v48, %v696_v2 }
 0x1eb   :  { %1779 = vpow2.f32 %v759_v21  ;;  %v767_v36 = vmul.f32 1.442695, %v730_v3  ;;  %v781_v18 = vmul.f32 1.442695, %v737_v7  ;;  %v732_v48 = vsub.f32 %v2239_v53, %v696_v2 }
 0x1ec   :  { %1781 = vpow2.f32 %v757_v25  ;;  %v769_v37 = vmul.f32 1.442695, %v731_v56  ;;  %v733_v22 = vsub.f32 %v2204_v62, %v697_v55  ;;  %v740_v27 = vsub.f32 %v2260_v57, %v700_v43 }
 0x1ed   :  { %1783 = vpow2.f32 %v761_v59  ;;  %v771_v26 = vmul.f32 1.442695, %v732_v48  ;;  %v735_v62 = vsub.f32 %v2202_v5, %v698_v61  ;;  %v736_v57 = vsub.f32 %v2215_v12, %v698_v61 }
 0x1ee   :  { %1785 = vpow2.f32 %v763_v13  ;;  %v773_v0 = vmul.f32 1.442695, %v733_v22  ;;  %v787_v15 = vmul.f32 1.442695, %v740_v27  ;;  %v738_v5 = vsub.f32 %v2213_v11, %v699_v33 }
 0x1ef   :  { %1787 = vpow2.f32 %v765_v1  ;;  %v777_v14 = vmul.f32 1.442695, %v735_v62  ;;  %v779_v19 = vmul.f32 1.442695, %v736_v57  ;;  %v739_v12 = vsub.f32 %v2237_v24, %v700_v43 }
 0x1f0   :  { %1789 = vpow2.f32 %v775_v32  ;;  %v783_v21 = vmul.f32 1.442695, %v738_v5 }
 0x1f1   :  { %v2366_v31 = vpop.eup %1779  ;;  %1791 = vpow2.f32 %v767_v36  ;;  %v785_v25 = vmul.f32 1.442695, %v739_v12 }
 0x1f2   :  { %v2369_v34 = vpop.eup %1781  ;;  %857 = vperm.xlu2 %1775, %v2366_v31   ;;  %1793 = vpow2.f32 %v769_v37 }
 0x1f3   :  { %v2372_v6 = vpop.eup %1783  ;;  %854 = vperm.xlu1 %1774, %v2369_v34   ;;  %1795 = vpow2.f32 %v781_v18 }
 0x1f4   :  { %860 = vperm.xlu0 %1776, %v2372_v6   ;;  %v2379_v39 = vpop.eup %1785  ;;  %1797 = vpow2.f32 %v771_v26 }
 0x1f5   :  { %v2382_v44 = vpop.eup %1787  ;;  %1799 = vpow2.f32 %v773_v0 }
 0x1f6   :  { %v2385_v8 = vpop.eup %1789  ;;  %1801 = vpow2.f32 %v787_v15 }
 0x1f7   :  { %v2393_v9 = vpop.eup %1791  ;;  %1803 = vpow2.f32 %v777_v14 }
 0x1f8   :  { %v2395_v16 = vpop.eup %1793  ;;  %1805 = vpow2.f32 %v779_v19 }
 0x1f9   :  { %v2398_v53 = vpop.eup %1795  ;;  %1807 = vpow2.f32 %v783_v21 }
 0x1fa   :  { %863 = vperm.xlu2 %1775, %v2379_v39   ;;  %v2404_v20 = vpop.eup %1797  ;;  %1809 = vpow2.f32 %v785_v25 }
 0x1fb   :  { %866 = vperm.xlu1 %1774, %v2382_v44   ;;  %v2406_v60 = vpop.eup %1799 }
 0x1fc   :  { %881 = vperm.xlu0 %1776, %v2385_v8   ;;  %v2409_v23 = vpop.eup %1801 }
 0x1fd   :  { %v2419_v29 = vpop.eup %1803 }
 0x1fe   :  { %v2421_v4 = vpop.eup %1805 }
 0x1ff   :  { %v2430_v56 = vpop.eup %1807 }
 0x200   :  { %v2432_v7 = vpop.eup %1809 }
 0x202   :  { %869 = vperm.xlu2 %1775, %v2393_v9  }
 0x203   :  { %872 = vperm.xlu1 %1774, %v2395_v16  }
 0x204   :  { %890 = vperm.xlu0 %1776, %v2398_v53  }
 0x20a   :  { %875 = vperm.xlu2 %1775, %v2404_v20  }
 0x20b   :  { %878 = vperm.xlu1 %1774, %v2406_v60  }
 0x20c   :  { %899 = vperm.xlu0 %1776, %v2409_v23  }
 0x20e   :  { %v2415_v55 = vpop.xlane.xlu0 %689 }
 0x20f   :  { %v702_v59 = vperm.slane %v2415_v55, 1  ;;  %v701_v28 = vperm.slane %v2415_v55, 0  ;;  %v703_v13 = vperm.slane %v2415_v55, 2  ;;  %v705_v36 = vperm.slane %v2415_v55, 4 }
 0x210   :  { %v704_v43 = vperm.slane %v2415_v55, 3  ;;  %v706_v26 = vperm.slane %v2415_v55, 5  ;;  %v707_v25 = vperm.slane %v2415_v55, 6 }
 0x211   :  { %v743_v11 = vsub.f32 %v2277_v45, %v702_v59  ;;  %v741_v24 = vsub.f32 %v2271_v42, %v701_v28  ;;  %v742_v2 = vsub.f32 %v2269_v40, %v701_v28  ;;  %v746_v32 = vsub.f32 %v2283_v51, %v703_v13 }
 0x212   :  { %884 = vperm.xlu2 %1775, %v2419_v29   ;;  %v744_v42 = vsub.f32 %v2281_v49, %v702_v59  ;;  %v745_v51 = vsub.f32 %v2279_v63, %v703_v13  ;;  %v749_v37 = vsub.f32 %v2289_v46, %v705_v36  ;;  %v747_v63 = vsub.f32 %v2313_v41, %v704_v43 }
 0x213   :  { %887 = vperm.xlu1 %1774, %v2421_v4   ;;  %v793_v1 = vmul.f32 1.442695, %v743_v11  ;;  %v789_v33 = vmul.f32 1.442695, %v741_v24  ;;  %v791_v3 = vmul.f32 1.442695, %v742_v2  ;;  %v748_v46 = vsub.f32 %v2285_v47, %v704_v43 }
 0x214   :  { %v799_v45 = vmul.f32 1.442695, %v746_v32  ;;  %v795_v18 = vmul.f32 1.442695, %v744_v42  ;;  %v797_v48 = vmul.f32 1.442695, %v745_v51  ;;  %v752_v0 = vsub.f32 %v2307_v17, %v706_v26 }
 0x215   :  { %1811 = vpow2.f32 %v793_v1  ;;  %v805_v49 = vmul.f32 1.442695, %v749_v37  ;;  %v801_v15 = vmul.f32 1.442695, %v747_v63  ;;  %v803_v62 = vmul.f32 1.442695, %v748_v46 }
 0x216   :  { %1813 = vpow2.f32 %v789_v33  ;;  %v811_v19 = vmul.f32 1.442695, %v752_v0  ;;  %v708_v41 = vperm.slane %v2415_v55, 7  ;;  %v750_v47 = vsub.f32 %v2287_v54, %v705_v36 }
 0x217   :  { %1815 = vpow2.f32 %v791_v3  ;;  %v751_v17 = vsub.f32 %v2293_v58, %v706_v26  ;;  %v753_v58 = vsub.f32 %v2291_v50, %v707_v25 }
 0x218   :  { %1817 = vpow2.f32 %v799_v45  ;;  %v755_v12 = vsub.f32 %v2336_v35, %v708_v41  ;;  %v807_v21 = vmul.f32 1.442695, %v750_v47  ;;  %v754_v35 = vsub.f32 %v2326_v30, %v707_v25 }
 0x219   :  { %1819 = vpow2.f32 %v795_v18  ;;  %v809_v59 = vmul.f32 1.442695, %v751_v17  ;;  %v813_v55 = vmul.f32 1.442695, %v753_v58  ;;  %v756_v50 = vsub.f32 %v2341_v38, %v708_v41 }
 0x21a   :  { %893 = vperm.xlu2 %1775, %v2430_v56   ;;  %1821 = vpow2.f32 %v797_v48  ;;  %v817_v54 = vmul.f32 1.442695, %v755_v12  ;;  %v815_v24 = vmul.f32 1.442695, %v754_v35 }
 0x21b   :  { %896 = vperm.xlu1 %1774, %v2432_v7   ;;  %v2438_v40 = vpop.eup %1811  ;;  %1823 = vpow2.f32 %v805_v49  ;;  %v819_v30 = vmul.f32 1.442695, %v756_v50 }
 0x21c   :  { %908 = vperm.xlu0 %1776, %v2438_v40   ;;  %v2444_v22 = vpop.eup %1813  ;;  %1825 = vpow2.f32 %v801_v15 }
 0x21d   :  { %v2446_v27 = vpop.eup %1815  ;;  %1827 = vpow2.f32 %v803_v62 }
 0x21e   :  { %v2452_v61 = vpop.eup %1817  ;;  %1829 = vpow2.f32 %v811_v19 }
 0x21f   :  { %v2457_v57 = vpop.eup %1819  ;;  %1831 = vpow2.f32 %v807_v21 }
 0x220   :  { %v2459_v14 = vpop.eup %1821  ;;  %1833 = vpow2.f32 %v809_v59 }
 0x221   :  { %v2465_v5 = vpop.eup %1823  ;;  %1835 = vpow2.f32 %v817_v54 }
 0x222   :  { %902 = vperm.xlu2 %1775, %v2444_v22   ;;  %v2471_v28 = vpop.eup %1825  ;;  %1837 = vpow2.f32 %v813_v55 }
 0x223   :  { %905 = vperm.xlu1 %1774, %v2446_v27   ;;  %v2473_v11 = vpop.eup %1827  ;;  %1839 = vpow2.f32 %v815_v24 }
 0x224   :  { %917 = vperm.xlu0 %1776, %v2452_v61   ;;  %v2478_v13 = vpop.eup %1829  ;;  %1841 = vpow2.f32 %v819_v30 }
 0x225   :  { %v2482_v1 = vpop.eup %1831 }
 0x226   :  { %v2484_v2 = vpop.eup %1833 }
 0x227   :  { %v2489_v32 = vpop.eup %1835 }
 0x228   :  { %v2492_v33 = vpop.eup %1837 }
 0x229   :  { %v2494_v3 = vpop.eup %1839 }
 0x22a   :  { %911 = vperm.xlu2 %1775, %v2457_v57   ;;  %v2498_v45 = vpop.eup %1841 }
 0x22b   :  { %914 = vperm.xlu1 %1774, %v2459_v14  }
 0x22c   :  { %926 = vperm.xlu0 %1776, %v2465_v5  }
 0x232   :  { %920 = vperm.xlu2 %1775, %v2471_v28  }
 0x233   :  { %923 = vperm.xlu1 %1774, %v2473_v11  }
 0x234   :  { %935 = vperm.xlu0 %1776, %v2478_v13  }
 0x23a   :  { %929 = vperm.xlu2 %1775, %v2482_v1  }
 0x23b   :  { %932 = vperm.xlu1 %1774, %v2484_v2  }
 0x23c   :  { %944 = vperm.xlu0 %1776, %v2489_v32  }
 0x242   :  { %938 = vperm.xlu2 %1775, %v2492_v33  }
 0x243   :  { %941 = vperm.xlu1 %1774, %v2494_v3  }
 0x24a   :  { %947 = vperm.xlu2 %1775, %v2498_v45  }
 0x24c   :  { %v858_v38 = vpop.permute.xlu2 %857 }
 0x24d   :  { %v950_v47 = vperm.slane %v858_v38, %v2211_v52 }
 0x254   :  { %v864_v36 = vpop.permute.xlu2 %863 }
 0x255   :  { %v953_v17 = vperm.slane %v864_v36, %v2211_v52 }
 0x25c   :  { %v870_v42 = vpop.permute.xlu2 %869 }
 0x25d   :  { %v956_v21 = vperm.slane %v870_v42, %v2211_v52 }
 0x264   :  { %v876_v51 = vpop.permute.xlu2 %875 }
 0x265   :  { %v855_v37 = vpop.permute.xlu1 %854  ;;  %v959_v54 = vperm.slane %v876_v51, %v2211_v52 }
 0x266   :  { %v861_v18 = vpop.permute.xlu0 %860  ;;  %v949_v62 = vperm.slane %v855_v37, %v2206_v10 }
 0x267   :  { %v952_v15 = vperm.slane %v861_v18, %v2206_v10 }
 0x268   :  { %v951_v35 = vsel %vm614_vm2, %v950_v47, %v949_v62 }
 0x269   :  { %v954_v58 = vsel %vm614_vm2, %v953_v17, %v952_v15 }
 0x26a   :  { %v997_v42 = vsel %vm661_vm3, %v954_v58, %v951_v35 }
 0x26c   :  { %v885_v48 = vpop.permute.xlu2 %884 }
 0x26d   :  { %v867_v43 = vpop.permute.xlu1 %866  ;;  %v964_v38 = vperm.slane %v885_v48, %v2206_v10 }
 0x26e   :  { %v882_v49 = vpop.permute.xlu0 %881  ;;  %v955_v41 = vperm.slane %v867_v43, %v2206_v10 }
 0x26f   :  { %v962_v24 = vperm.slane %v882_v49, %v2211_v52 }
 0x270   :  { %v957_v50 = vsel %vm614_vm2, %v956_v21, %v955_v41 }
 0x271   :  { %v998_v51 = vsel %vm663_vm4, %v957_v50, %v997_v42 }
 0x274   :  { %v894_v63 = vpop.permute.xlu2 %893 }
 0x275   :  { %v873_v26 = vpop.permute.xlu1 %872  ;;  %v968_v43 = vperm.slane %v894_v63, %v2211_v52 }
 0x276   :  { %v891_v46 = vpop.permute.xlu0 %890  ;;  %v958_v12 = vperm.slane %v873_v26, %v2206_v10 }
 0x277   :  { %v967_v26 = vperm.slane %v891_v46, %v2206_v10 }
 0x278   :  { %v960_v36 = vsel %vm614_vm2, %v959_v54, %v958_v12 }
 0x279   :  { %v999_v49 = vsel %vm665_vm5, %v960_v36, %v998_v51  ;;  %v969_v17 = vsel %vm614_vm2, %v968_v43, %v967_v26 }
 0x27c   :  { %v903_v19 = vpop.permute.xlu2 %902 }
 0x27d   :  { %v879_v0 = vpop.permute.xlu1 %878 }
 0x27e   :  { %v961_v25 = vperm.slane %v879_v0, %v2206_v10  ;;  %v900_v30 = vpop.permute.xlu0 %899 }
 0x27f   :  { %v971_v41 = vperm.slane %v900_v30, %v2211_v52 }
 0x280   :  { %v963_v37 = vsel %vm614_vm2, %v962_v24, %v961_v25 }
 0x281   :  { %v1000_v0 = vsel %vm667_vm6, %v963_v37, %v999_v49  ;;  %v973_v37 = vperm.slane %v903_v19, %v2206_v10 }
 0x284   :  { %v912_v15 = vpop.permute.xlu2 %911 }
 0x285   :  { %v888_v59 = vpop.permute.xlu1 %887  ;;  %v977_v49 = vperm.slane %v912_v15, %v2211_v52 }
 0x286   :  { %v965_v55 = vperm.slane %v888_v59, %v2211_v52 }
 0x288   :  { %v966_v18 = vsel %vm614_vm2, %v965_v55, %v964_v38 }
 0x289   :  { %v1001_v62 = vsel %vm669_vm7, %v966_v18, %v1000_v0 }
 0x28a   :  { %v1002_v63 = vsel %vm671_vm8, %v969_v17, %v1001_v62 }
 0x28c   :  { %v921_v54 = vpop.permute.xlu2 %920 }
 0x28d   :  { %v897_v48 = vpop.permute.xlu1 %896  ;;  %v982_v0 = vperm.slane %v921_v54, %v2206_v10 }
 0x28e   :  { %v970_v47 = vperm.slane %v897_v48, %v2206_v10  ;;  %v909_v12 = vpop.permute.xlu0 %908 }
 0x28f   :  { %v976_v51 = vperm.slane %v909_v12, %v2206_v10 }
 0x290   :  { %v972_v21 = vsel %vm614_vm2, %v971_v41, %v970_v47 }
 0x291   :  { %v1003_v46 = vsel %vm673_vm9, %v972_v21, %v1002_v63  ;;  %v978_v41 = vsel %vm614_vm2, %v977_v49, %v976_v51 }
 0x292   :  { %v1013_v25 = vsel %vm684_vm10, %v1003_v46, 0.0 }
 0x293   :  { %1014 = vadd.xlane.f32.xlu1 %v1013_v25 }
 0x294   :  { %v930_v24 = vpop.permute.xlu2 %929 }
 0x295   :  { %v906_v59 = vpop.permute.xlu1 %905  ;;  %v986_v46 = vperm.slane %v930_v24, %v2211_v52 }
 0x296   :  { %v918_v58 = vpop.permute.xlu0 %917  ;;  %v974_v36 = vperm.slane %v906_v59, %v2211_v52 }
 0x297   :  { %v980_v26 = vperm.slane %v918_v58, %v2211_v52 }
 0x298   :  { %v975_v48 = vsel %vm614_vm2, %v974_v36, %v973_v37 }
 0x299   :  { %v1004_v17 = vsel %vm661_vm3, %v978_v41, %v975_v48 }
 0x29c   :  { %v939_v38 = vpop.permute.xlu2 %938 }
 0x29d   :  { %v915_v35 = vpop.permute.xlu1 %914 }
 0x29e   :  { %v927_v55 = vpop.permute.xlu0 %926  ;;  %v979_v42 = vperm.slane %v915_v35, %v2206_v10 }
 0x29f   :  { %v985_v12 = vperm.slane %v927_v55, %v2206_v10 }
 0x2a0   :  { %v981_v62 = vsel %vm614_vm2, %v980_v26, %v979_v42 }
 0x2a1   :  { %v1005_v63 = vsel %vm663_vm4, %v981_v62, %v1004_v17  ;;  %v987_v36 = vsel %vm614_vm2, %v986_v46, %v985_v12 }
 0x2a4   :  { %v948_v25 = vpop.permute.xlu2 %947 }
 0x2a5   :  { %v924_v50 = vpop.permute.xlu1 %923  ;;  %v995_v42 = vperm.slane %v948_v25, %v2211_v52 }
 0x2a6   :  { %v936_v30 = vpop.permute.xlu0 %935  ;;  %v983_v18 = vperm.slane %v924_v50, %v2211_v52  ;;  %v991_v50 = vperm.slane %v939_v38, %v2206_v10 }
 0x2a7   :  { %v989_v15 = vperm.slane %v936_v30, %v2211_v52 }
 0x2a8   :  { %v984_v47 = vsel %vm614_vm2, %v983_v18, %v982_v0 }
 0x2a9   :  { %v1006_v59 = vsel %vm665_vm5, %v984_v47, %v1005_v63 }
 0x2aa   :  { %v1007_v30 = vsel %vm667_vm6, %v987_v36, %v1006_v59 }
 0x2ad   :  { %v933_v43 = vpop.permute.xlu1 %932 }
 0x2ae   :  { %v988_v19 = vperm.slane %v933_v43, %v2206_v10  ;;  %v945_v21 = vpop.permute.xlu0 %944 }
 0x2af   :  { %v994_v58 = vperm.slane %v945_v21, %v2206_v10 }
 0x2b0   :  { %v990_v54 = vsel %vm614_vm2, %v989_v15, %v988_v19 }
 0x2b1   :  { %v1008_v37 = vsel %vm669_vm7, %v990_v54, %v1007_v30  ;;  %v996_v51 = vsel %vm614_vm2, %v995_v42, %v994_v58 }
 0x2b5   :  { %v942_v35 = vpop.permute.xlu1 %941 }
 0x2b6   :  { %v992_v55 = vperm.slane %v942_v35, %v2211_v52 }
 0x2b8   :  { %v993_v24 = vsel %vm614_vm2, %v992_v55, %v991_v50 }
 0x2b9   :  { %v1009_v18 = vsel %vm671_vm8, %v993_v24, %v1008_v37 }
 0x2ba   :  { %v1010_v43 = vsel %vm673_vm9, %v996_v51, %v1009_v18 }
 0x2bb   :  { %v1016_v38 = vsel %vm684_vm10, %v1010_v43, 0.0 }
 0x2bc   :  { %1017 = vadd.xlane.f32.xlu0 %v1016_v38 }
 0x306   :  { %v1015_v26 = vpop.xlane.xlu1 %1014 }
 0x307   :  { %1843 = vrcp.f32 %v1015_v26 }
 0x30d   :  { %v1844_v49 = vpop.eup %1843 }
 0x30e   :  { %v1021_v0 = vmul.f32 %v1844_v49, %v1015_v26 }
 0x310   :  { %v1023_v48 = vsub.f32 2.0, %v1021_v0 }
 0x312   :  { %v2565_v62 = vmul.f32 %v1844_v49, %v1023_v48 }
 0x314   :  { %v1032_v41 = vperm.slane %v2565_v62, 3  ;;  %v1031_v47 = vperm.slane %v2565_v62, 2  ;;  %v1029_v19 = vperm.slane %v2565_v62, 0  ;;  %v1034_v63 = vperm.slane %v2565_v62, 5 }
 0x316   :  { %v1068_v17 = vmul.f32 %v2404_v20, %v1032_v41  ;;  %v1066_v12 = vmul.f32 %v2393_v9, %v1031_v47  ;;  %v1061_v21 = vmul.f32 %v2369_v34, %v1029_v19  ;;  %v1072_v15 = vmul.f32 %v2421_v4, %v1034_v63 }
 0x317   :  { %v1071_v46 = vmul.f32 %v2419_v29, %v1034_v63  ;;  %v1062_v25 = vmul.f32 %v2366_v31, %v1029_v19  ;;  %v1036_v20 = vperm.slane %v2565_v62, 7  ;;  %v1035_v9 = vperm.slane %v2565_v62, 6  ;;  %v1464_v63 = vld [vmem:[#allocation2 + $0x18] sm:$0xff] }
 0x318   :  { %1147 = vperm.xlu0 %1776, %v1068_v17   ;;  %1141 = vperm.xlu1 %1774, %v1066_v12   ;;  %v1030_v34 = vperm.slane %v2565_v62, 1  ;;  %v1065_v50 = vmul.f32 %v2382_v44, %v1031_v47  ;;  %v1288_v17 = vld [vmem:[#allocation2 + $0x10] sm:$0xff] }
 0x319   :  { %1126 = vperm.xlu2 %1775, %v1061_v21   ;;  %v1075_v59 = vmul.f32 %v2432_v7, %v1036_v20  ;;  %v1074_v54 = vmul.f32 %v2430_v56, %v1035_v9  ;;  %v1067_v56 = vmul.f32 %v2395_v16, %v1032_v41 }
 0x31a   :  { %v1063_v58 = vmul.f32 %v2372_v6, %v1030_v34  ;;  %v1064_v31 = vmul.f32 %v2379_v39, %v1030_v34  ;;  %v1033_v39 = vperm.slane %v2565_v62, 4  ;;  %v1287_v62 = vld [vmem:[#allocation2] sm:$0xff] }
 0x31c   :  { %v1069_v37 = vmul.f32 %v2406_v60, %v1033_v39  ;;  %v1073_v60 = vmul.f32 %v2398_v53, %v1035_v9  ;;  %v1465_v9 = vld [vmem:[#allocation2 + $0x28] sm:$0xff] }
 0x320   :  { %1159 = vperm.xlu0 %1776, %v1072_v15   ;;  %1156 = vperm.xlu1 %1774, %v1071_v46   ;;  %v1466_v46 = vld [vmem:[#allocation2 + $0x38] sm:$0xff] }
 0x321   :  { %1129 = vperm.xlu2 %1775, %v1062_v25  }
 0x328   :  { %1168 = vperm.xlu0 %1776, %v1075_v59   ;;  %1165 = vperm.xlu1 %1774, %v1074_v54  }
 0x329   :  { %1132 = vperm.xlu2 %1775, %v1063_v58  }
 0x32f   :  { %v1018_v29 = vpop.xlane.xlu0 %1017 }
 0x330   :  { %1845 = vrcp.f32 %v1018_v29 }
 0x331   :  { %1135 = vperm.xlu2 %1775, %v1064_v31  }
 0x336   :  { %v1846_v4 = vpop.eup %1845 }
 0x337   :  { %v1022_v35 = vmul.f32 %v1846_v4, %v1018_v29 }
 0x339   :  { %v1024_v36 = vsub.f32 2.0, %v1022_v35  ;;  %1138 = vperm.xlu2 %1775, %v1065_v50  }
 0x33b   :  { %v1026_v55 = vmul.f32 %v1846_v4, %v1024_v36 }
 0x33d   :  { %v1037_v7 = vperm.slane %v1026_v55, 0  ;;  %v1039_v30 = vperm.slane %v1026_v55, 2  ;;  %v1038_v24 = vperm.slane %v1026_v55, 1  ;;  %v1040_v16 = vperm.slane %v1026_v55, 3 }
 0x33e   :  { %v1042_v43 = vperm.slane %v1026_v55, 5  ;;  %v1041_v38 = vperm.slane %v1026_v55, 4  ;;  %v1043_v26 = vperm.slane %v1026_v55, 6  ;;  %v1044_v49 = vperm.slane %v1026_v55, 7 }
 0x33f   :  { %v1078_v6 = vmul.f32 %v2446_v27, %v1037_v7  ;;  %v1077_v42 = vmul.f32 %v2444_v22, %v1037_v7  ;;  %v1081_v44 = vmul.f32 %v2459_v14, %v1039_v30  ;;  %v1080_v51 = vmul.f32 %v2457_v57, %v1038_v24 }
 0x340   :  { %v1070_v27 = vmul.f32 %v2385_v8, %v1033_v39  ;;  %v1084_v22 = vmul.f32 %v2473_v11, %v1040_v16  ;;  %v1083_v18 = vmul.f32 %v2471_v28, %v1040_v16  ;;  %v1087_v14 = vmul.f32 %v2484_v2, %v1042_v43  ;;  %v1292_v16 = vld [vmem:[#allocation2 + $0x50] sm:$0xff] }
 0x341   :  { %1144 = vperm.xlu2 %1775, %v1067_v56   ;;  %1177 = vperm.xlu0 %1776, %v1078_v6   ;;  %v1086_v57 = vmul.f32 %v2482_v1, %v1041_v38  ;;  %v1076_v8 = vmul.f32 %v2409_v23, %v1036_v20  ;;  %v1090_v11 = vmul.f32 %v2494_v3, %v1043_v26  ;;  %v1289_v6 = vld [vmem:[#allocation2 + $0x20] sm:$0xff] }
 0x342   :  { %1174 = vperm.xlu1 %1774, %v1077_v42   ;;  %v1089_v28 = vmul.f32 %v2492_v33, %v1043_v26  ;;  %v1079_v53 = vmul.f32 %v2438_v40, %v1038_v24  ;;  %v1092_v2 = vmul.f32 %v2498_v45, %v1044_v49  ;;  %v1082_v1 = vmul.f32 %v2452_v61, %v1039_v30  ;;  %v1463_v40 = vld [vmem:[#allocation2 + $0x8] sm:$0xff] }
 0x343   :  { %v1085_v23 = vmul.f32 %v2465_v5, %v1041_v38  ;;  %v1088_v33 = vmul.f32 %v2478_v13, %v1042_v43  ;;  %v1091_v45 = vmul.f32 %v2489_v32, %v1044_v49 }
 0x349   :  { %1150 = vperm.xlu2 %1775, %v1069_v37   ;;  %1186 = vperm.xlu0 %1776, %v1081_v44   ;;  %v1468_v44 = vld [vmem:[#allocation2 + $0x58] sm:$0xff] }
 0x34a   :  { %1183 = vperm.xlu1 %1774, %v1080_v51  }
 0x351   :  { %1153 = vperm.xlu2 %1775, %v1070_v27   ;;  %1195 = vperm.xlu0 %1776, %v1084_v22  }
 0x352   :  { %1192 = vperm.xlu1 %1774, %v1083_v18  }
 0x359   :  { %1162 = vperm.xlu2 %1775, %v1073_v60   ;;  %1204 = vperm.xlu0 %1776, %v1087_v14  }
 0x35a   :  { %1201 = vperm.xlu1 %1774, %v1086_v57  }
 0x361   :  { %1171 = vperm.xlu2 %1775, %v1076_v8   ;;  %1213 = vperm.xlu0 %1776, %v1090_v11  }
 0x362   :  { %1210 = vperm.xlu1 %1774, %v1089_v28  }
 0x369   :  { %1180 = vperm.xlu2 %1775, %v1079_v53  }
 0x36a   :  { %1219 = vperm.xlu1 %1774, %v1092_v2  }
 0x371   :  { %1189 = vperm.xlu2 %1775, %v1082_v1   ;;  %v1290_v1 = vld [vmem:[#allocation2 + $0x30] sm:$0xff] }
 0x373   :  { %v2604_v0 = vpop.permute.xlu2 %1126 }
 0x374   :  { %v1319_v61 = vmul.f32 %v1287_v62, %v2604_v0 }
 0x376   :  { %v1335_v19 = vsel %vm83_vm0, %v1319_v61, 0.0 }
 0x377   :  { %v1336_v12 = vrot.slane %v1335_v19, 4 }
 0x379   :  { %1198 = vperm.xlu2 %1775, %v1085_v23   ;;  %v1337_v20 = vadd.f32 %v1336_v12, %v1335_v19 }
 0x37b   :  { %v2607_v3 = vpop.permute.xlu2 %1129  ;;  %v1338_v4 = vrot.slane %v1337_v20, 2 }
 0x37c   :  { %v1495_v41 = vmul.f32 %v1463_v40, %v2607_v3  ;;  %v1222_v49 = vperm.slane %v2607_v3, %v2211_v52 }
 0x37d   :  { %v1339_v39 = vadd.f32 %v1338_v4, %v1337_v20  ;;  %v1294_v20 = vld [vmem:[#allocation2 + $0x70] sm:$0xff] }
 0x37e   :  { %v1511_v5 = vsel %vm83_vm0, %v1495_v41, 0.0 }
 0x37f   :  { %v1512_v13 = vrot.slane %v1511_v5, 4  ;;  %v1340_v38 = vrot.slane %v1339_v39, 1 }
 0x381   :  { %1207 = vperm.xlu2 %1775, %v1088_v33   ;;  %v1513_v15 = vadd.f32 %v1512_v13, %v1511_v5  ;;  %v1221_v33 = vperm.slane %v2604_v0, %v2206_v10  ;;  %v1341_v40 = vadd.f32 %v1340_v38, %v1339_v39 }
 0x383   :  { %v2610_v48 = vpop.permute.xlu2 %1132  ;;  %v1514_v29 = vrot.slane %v1513_v15, 2  ;;  %v1223_v13 = vsel %vm614_vm2, %v1222_v49, %v1221_v33 }
 0x384   :  { %v1320_v21 = vmul.f32 %v1288_v17, %v2610_v48  ;;  %v1224_v62 = vperm.slane %v2610_v48, %v2206_v10 }
 0x385   :  { %v1515_v55 = vadd.f32 %v1514_v29, %v1513_v15 }
 0x386   :  { %v1342_v54 = vsel %vm83_vm0, %v1320_v21, 0.0  ;;  %v1291_v21 = vld [vmem:[#allocation2 + $0x40] sm:$0xff] }
 0x387   :  { %v1343_v35 = vrot.slane %v1342_v54, 4  ;;  %v1516_v18 = vrot.slane %v1515_v55, 1 }
 0x389   :  { %1216 = vperm.xlu2 %1775, %v1091_v45   ;;  %v1344_v30 = vadd.f32 %v1343_v35, %v1342_v54  ;;  %v1517_v53 = vadd.f32 %v1516_v18, %v1515_v55  ;;  %v1467_v35 = vld [vmem:[#allocation2 + $0x48] sm:$0xff] }
 0x38a   :  { %v2620_v32 = vpop.permute.xlu0 %1147  ;;  %v2624_v34 = vpop.permute.xlu1 %1141 }
 0x38b   :  { %v2615_v47 = vpop.permute.xlu2 %1135  ;;  %v1498_v58 = vmul.f32 %v1466_v46, %v2620_v32  ;;  %v1497_v31 = vmul.f32 %v1465_v9, %v2624_v34  ;;  %v1345_v60 = vrot.slane %v1344_v30, 2  ;;  %v2658_v12 = vadd.f32 %v1517_v53, %v1341_v40  ;;  %v1293_v40 = vld [vmem:[#allocation2 + $0x60] sm:$0xff] }
 0x38c   :  { %v1496_v59 = vmul.f32 %v1464_v63, %v2615_v47  ;;  %v1225_v11 = vperm.slane %v2615_v47, %v2211_v52  ;;  %v1231_v48 = vperm.slane %v2620_v32, %v2211_v52  ;;  %v1228_v63 = vperm.slane %v2624_v34, %v2211_v52 }
 0x38d   :  { %v1532_v36 = vsel %vm83_vm0, %v1498_v58, 0.0  ;;  %v1525_v7 = vsel %vm83_vm0, %v1497_v31, 0.0  ;;  %v1346_v45 = vadd.f32 %v1345_v60, %v1344_v30 }
 0x38e   :  { %v1518_v50 = vsel %vm83_vm0, %v1496_v59, 0.0  ;;  %v1533_v24 = vrot.slane %v1532_v36, 4  ;;  %v1526_v37 = vrot.slane %v1525_v7, 4  ;;  %v1226_v19 = vsel %vm614_vm2, %v1225_v11, %v1224_v62  ;;  %v1469_v59 = vld [vmem:[#allocation2 + $0x68] sm:$0xff] }
 0x38f   :  { %v1519_v56 = vrot.slane %v1518_v50, 4  ;;  %v1347_v58 = vrot.slane %v1346_v45, 1  ;;  %v1269_v31 = vsel %vm661_vm3, %v1226_v19, %v1223_v13 }
 0x390   :  { %v1534_v14 = vadd.f32 %v1533_v24, %v1532_v36  ;;  %v1527_v8 = vadd.f32 %v1526_v37, %v1525_v7 }
 0x391   :  { %v1520_v43 = vadd.f32 %v1519_v56, %v1518_v50 }
 0x392   :  { %v2635_v51 = vpop.permute.xlu0 %1159  ;;  %v2637_v27 = vpop.permute.xlu1 %1156  ;;  %v1535_v41 = vrot.slane %v1534_v14, 2  ;;  %v1528_v3 = vrot.slane %v1527_v8, 2 }
 0x393   :  { %v2622_v25 = vpop.permute.xlu2 %1138  ;;  %v1500_v57 = vmul.f32 %v1468_v44, %v2635_v51  ;;  %v1324_v26 = vmul.f32 %v1292_v16, %v2637_v27  ;;  %v1521_v2 = vrot.slane %v1520_v43, 2  ;;  %v1237_v7 = vperm.slane %v2635_v51, %v2211_v52 }
 0x394   :  { %v1321_v22 = vmul.f32 %v1289_v6, %v2622_v25  ;;  %v1536_v29 = vadd.f32 %v1535_v41, %v1534_v14  ;;  %v1529_v50 = vadd.f32 %v1528_v3, %v1527_v8  ;;  %v1227_v32 = vperm.slane %v2622_v25, %v2206_v10 }
 0x395   :  { %v1546_v61 = vsel %vm83_vm0, %v1500_v57, 0.0  ;;  %v1370_v47 = vsel %vm83_vm0, %v1324_v26, 0.0  ;;  %v1522_v0 = vadd.f32 %v1521_v2, %v1520_v43  ;;  %v1236_v24 = vperm.slane %v2637_v27, %v2206_v10 }
 0x396   :  { %v1349_v28 = vsel %vm83_vm0, %v1321_v22, 0.0  ;;  %v1547_v15 = vrot.slane %v1546_v61, 4  ;;  %v1371_v46 = vrot.slane %v1370_v47, 4  ;;  %v1348_v25 = vadd.f32 %v1347_v58, %v1346_v45 }
 0x397   :  { %v1350_v5 = vrot.slane %v1349_v28, 4  ;;  %v1523_v55 = vrot.slane %v1522_v0, 1  ;;  %v1537_v16 = vrot.slane %v1536_v29, 1  ;;  %v1530_v43 = vrot.slane %v1529_v50, 1 }
 0x398   :  { %v1548_v30 = vadd.f32 %v1547_v15, %v1546_v61  ;;  %v1372_v37 = vadd.f32 %v1371_v46, %v1370_v47  ;;  %v1229_v38 = vsel %vm614_vm2, %v1228_v63, %v1227_v32  ;;  %v2685_v11 = vsel %vm614_vm2, %v1237_v7, %v1236_v24 }
 0x399   :  { %v1351_v4 = vadd.f32 %v1350_v5, %v1349_v28  ;;  %v1524_v14 = vadd.f32 %v1523_v55, %v1522_v0  ;;  %v2689_v53 = vadd.f32 %v1537_v16, %v1536_v29  ;;  %v2691_v62 = vadd.f32 %v1530_v43, %v1529_v50 }
 0x39a   :  { %v2664_v9 = vpop.permute.xlu0 %1168  ;;  %v2666_v54 = vpop.permute.xlu1 %1165  ;;  %v1549_v27 = vrot.slane %v1548_v30, 2  ;;  %v1373_v28 = vrot.slane %v1372_v37, 2  ;;  %v1270_v45 = vsel %vm663_vm4, %v1229_v38, %v1269_v31 }
 0x39b   :  { %v2633_v42 = vpop.permute.xlu2 %1144  ;;  %v1326_v56 = vmul.f32 %v1294_v20, %v2664_v9  ;;  %v1501_v6 = vmul.f32 %v1469_v59, %v2666_v54  ;;  %v1352_v22 = vrot.slane %v1351_v4, 2  ;;  %v1624_v47 = vadd.f32 %v1524_v14, %v1348_v25  ;;  %v1472_v14 = vld [vmem:[#allocation2 + $0x98] sm:$0xff] }
 0x39c   :  { %v1322_v17 = vmul.f32 %v1290_v1, %v2633_v42  ;;  %v1230_v49 = vperm.slane %v2633_v42, %v2206_v10  ;;  %v1242_v5 = vperm.slane %v2664_v9, %v2206_v10  ;;  %v1550_v0 = vadd.f32 %v1549_v27, %v1548_v30 }
 0x39d   :  { %v1384_v57 = vsel %vm83_vm0, %v1326_v56, 0.0  ;;  %v1553_v26 = vsel %vm83_vm0, %v1501_v6, 0.0  ;;  %v1353_v2 = vadd.f32 %v1352_v22, %v1351_v4  ;;  %v2712_v55 = vsel %vm661_vm3, %v1624_v47, %v2658_v12 }
 0x39e   :  { %v1356_v34 = vsel %vm83_vm0, %v1322_v17, 0.0  ;;  %v1385_v41 = vrot.slane %v1384_v57, 4  ;;  %v1554_v61 = vrot.slane %v1553_v26, 4  ;;  %v1471_v17 = vld [vmem:[#allocation2 + $0x88] sm:$0xff]  ;;  %v1232_v63 = vsel %vm614_vm2, %v1231_v48, %v1230_v49 }
 0x39f   :  { %v1357_v18 = vrot.slane %v1356_v34, 4  ;;  %v1354_v20 = vrot.slane %v1353_v2, 1  ;;  %v1551_v7 = vrot.slane %v1550_v0, 1  ;;  %v1240_v56 = vperm.slane %v2666_v54, %v2211_v52 }
 0x3a0   :  { %v1386_v29 = vadd.f32 %v1385_v41, %v1384_v57  ;;  %v1555_v31 = vadd.f32 %v1554_v61, %v1553_v26  ;;  %v1271_v6 = vsel %vm665_vm5, %v1232_v63, %v1270_v45 }
 0x3a1   :  { %v1358_v1 = vadd.f32 %v1357_v18, %v1356_v34  ;;  %v1355_v25 = vadd.f32 %v1354_v20, %v1353_v2  ;;  %v1552_v20 = vadd.f32 %v1551_v7, %v1550_v0 }
 0x3a2   :  { %v1387_v18 = vrot.slane %v1386_v29, 2  ;;  %v1556_v43 = vrot.slane %v1555_v31, 2 }
 0x3a3   :  { %v2647_v23 = vpop.permute.xlu2 %1150  ;;  %v1359_v59 = vrot.slane %v1358_v1, 2  ;;  %v1625_v0 = vadd.f32 %v2691_v62, %v1355_v25 }
 0x3a4   :  { %v1323_v36 = vmul.f32 %v1291_v21, %v2647_v23  ;;  %v2699_v21 = vadd.f32 %v1373_v28, %v1372_v37  ;;  %v1233_v9 = vperm.slane %v2647_v23, %v2206_v10  ;;  %v1470_v37 = vld [vmem:[#allocation2 + $0x78] sm:$0xff]  ;;  %v1388_v47 = vadd.f32 %v1387_v18, %v1386_v29 }
 0x3a6   :  { %v1363_v51 = vsel %vm83_vm0, %v1323_v36, 0.0  ;;  %v1295_v36 = vld [vmem:[#allocation2 + $0x80] sm:$0xff]  ;;  %v1375_v23 = vrot.slane %v2699_v21, 1  ;;  %v1389_v7 = vrot.slane %v1388_v47, 1 }
 0x3a7   :  { %v1364_v33 = vrot.slane %v1363_v51, 4 }
 0x3a8   :  { %v1376_v29 = vadd.f32 %v1375_v23, %v2699_v21 }
 0x3a9   :  { %v1365_v58 = vadd.f32 %v1364_v33, %v1363_v51 }
 0x3ab   :  { %v1154_v39 = vpop.permute.xlu2 %1153  ;;  %v1366_v30 = vrot.slane %v1365_v58, 2 }
 0x3ac   :  { %v1499_v44 = vmul.f32 %v1467_v35, %v1154_v39  ;;  %v1234_v3 = vperm.slane %v1154_v39, %v2211_v52  ;;  %v1360_v39 = vadd.f32 %v1359_v59, %v1358_v1 }
 0x3ad   :  { %v1367_v2 = vadd.f32 %v1366_v30, %v1365_v58  ;;  %v1296_v58 = vld [vmem:[#allocation2 + $0x90] sm:$0xff] }
 0x3ae   :  { %v1539_v60 = vsel %vm83_vm0, %v1499_v44, 0.0  ;;  %v1235_v50 = vsel %vm614_vm2, %v1234_v3, %v1233_v9  ;;  %v1297_v44 = vld [vmem:[#allocation2 + $0xa0] sm:$0xff]  ;;  %v1361_v49 = vrot.slane %v1360_v39, 1 }
 0x3af   :  { %v1540_v8 = vrot.slane %v1539_v60, 4  ;;  %v1272_v16 = vsel %vm667_vm6, %v1235_v50, %v1271_v6  ;;  %v1368_v59 = vrot.slane %v1367_v2, 1 }
 0x3b0   :  { %v1273_v1 = vsel %vm669_vm7, %v2685_v11, %v1272_v16 }
 0x3b1   :  { %v1541_v19 = vadd.f32 %v1540_v8, %v1539_v60  ;;  %v1369_v21 = vadd.f32 %v1368_v59, %v1367_v2  ;;  %v1390_v2 = vadd.f32 %v1389_v7, %v1388_v47 }
 0x3b3   :  { %v1163_v42 = vpop.permute.xlu2 %1162  ;;  %v2697_v13 = vpop.permute.xlu0 %1177  ;;  %v1542_v32 = vrot.slane %v1541_v19, 2 }
 0x3b4   :  { %v1325_v15 = vmul.f32 %v1293_v40, %v1163_v42  ;;  %v2702_v46 = vpop.permute.xlu1 %1174  ;;  %v1503_v35 = vmul.f32 %v1471_v17, %v2697_v13  ;;  %v1239_v48 = vperm.slane %v1163_v42, %v2206_v10 }
 0x3b5   :  { %v1327_v12 = vmul.f32 %v1295_v36, %v2702_v46  ;;  %v1543_v38 = vadd.f32 %v1542_v32, %v1541_v19  ;;  %v1474_v32 = vld [vmem:[#allocation2 + $0xb8] sm:$0xff] }
 0x3b6   :  { %v1377_v4 = vsel %vm83_vm0, %v1325_v15, 0.0  ;;  %v1567_v22 = vsel %vm83_vm0, %v1503_v35, 0.0  ;;  %v1241_v51 = vsel %vm614_vm2, %v1240_v56, %v1239_v48  ;;  %v1362_v35 = vadd.f32 %v1361_v49, %v1360_v39 }
 0x3b7   :  { %v1378_v34 = vrot.slane %v1377_v4, 4  ;;  %v1568_v33 = vrot.slane %v1567_v22, 4  ;;  %v1391_v40 = vsel %vm83_vm0, %v1327_v12, 0.0  ;;  %v1544_v3 = vrot.slane %v1543_v38, 1 }
 0x3b8   :  { %v1274_v19 = vsel %vm671_vm8, %v1241_v51, %v1273_v1  ;;  %v1392_v9 = vrot.slane %v1391_v40, 4  ;;  %v1656_v51 = vsel %vm663_vm4, %v1625_v0, %v2712_v55 }
 0x3b9   :  { %v1379_v24 = vadd.f32 %v1378_v34, %v1377_v4  ;;  %v1557_v4 = vadd.f32 %v1556_v43, %v1555_v31  ;;  %v1569_v50 = vadd.f32 %v1568_v33, %v1567_v22  ;;  %v1545_v48 = vadd.f32 %v1544_v3, %v1543_v38 }
 0x3ba   :  { %v1393_v31 = vadd.f32 %v1392_v9, %v1391_v40  ;;  %v1626_v22 = vadd.f32 %v2689_v53, %v1362_v35 }
 0x3bb   :  { %v1172_v54 = vpop.permute.xlu2 %1171  ;;  %v2722_v60 = vpop.permute.xlu0 %1186  ;;  %v1380_v57 = vrot.slane %v1379_v24, 2  ;;  %v1558_v16 = vrot.slane %v1557_v4, 1  ;;  %v1570_v12 = vrot.slane %v1569_v50, 2  ;;  %v1627_v43 = vadd.f32 %v1545_v48, %v1369_v21 }
 0x3bc   :  { %v1243_v26 = vperm.slane %v1172_v54, %v2211_v52  ;;  %v1502_v8 = vmul.f32 %v1470_v37, %v1172_v54  ;;  %v1329_v27 = vmul.f32 %v1297_v44, %v2722_v60  ;;  %v2726_v28 = vpop.permute.xlu1 %1183  ;;  %v1394_v53 = vrot.slane %v1393_v31, 2 }
 0x3bd   :  { %v1504_v61 = vmul.f32 %v1472_v14, %v2726_v28  ;;  %v1381_v17 = vadd.f32 %v1380_v57, %v1379_v24  ;;  %v1246_v14 = vperm.slane %v2697_v13, %v2211_v52  ;;  %v1559_v1 = vadd.f32 %v1558_v16, %v1557_v4  ;;  %v1299_v16 = vld [vmem:[#allocation2 + $0xc0] sm:$0xff] }
 0x3be   :  { %v1244_v45 = vsel %vm614_vm2, %v1243_v26, %v1242_v5  ;;  %v1560_v41 = vsel %vm83_vm0, %v1502_v8, 0.0  ;;  %v1405_v63 = vsel %vm83_vm0, %v1329_v27, 0.0  ;;  %v1298_v26 = vld [vmem:[#allocation2 + $0xb0] sm:$0xff]  ;;  %v1245_v8 = vperm.slane %v2702_v46, %v2206_v10 }
 0x3bf   :  { %v1561_v42 = vrot.slane %v1560_v41, 4  ;;  %v1574_v15 = vsel %vm83_vm0, %v1504_v61, 0.0  ;;  %v1275_v11 = vsel %vm673_vm9, %v1244_v45, %v1274_v19  ;;  %v1406_v36 = vrot.slane %v1405_v63, 4  ;;  %v1473_v45 = vld [vmem:[#allocation2 + $0xa8] sm:$0xff] }
 0x3c0   :  { %1285 = vst.msk [vmem:[#allocation6] sm:$0xff] %vm684_vm10, %v1275_v11  ;;  %v1575_v56 = vrot.slane %v1574_v15, 4  ;;  %v1382_v24 = vrot.slane %v1381_v17, 1  ;;  %v1657_v33 = vsel %vm665_vm5, %v1626_v22, %v1656_v51  ;;  %v1571_v40 = vadd.f32 %v1570_v12, %v1569_v50  ;;  %v1475_v50 = vld [vmem:[#allocation2 + $0xc8] sm:$0xff] }
 0x3c1   :  { %v1562_v5 = vadd.f32 %v1561_v42, %v1560_v41  ;;  %v1407_v62 = vadd.f32 %v1406_v36, %v1405_v63  ;;  %v1658_v19 = vsel %vm667_vm6, %v1627_v43, %v1657_v33  ;;  %v1628_v46 = vadd.f32 %v1552_v20, %v1376_v29  ;;  %v1477_v51 = vld [vmem:[#allocation2 + $0xe8] sm:$0xff] }
 0x3c2   :  { %v1576_v25 = vadd.f32 %v1575_v56, %v1574_v15  ;;  %v1383_v54 = vadd.f32 %v1382_v24, %v1381_v17  ;;  %v1247_v47 = vsel %vm614_vm2, %v1246_v14, %v1245_v8  ;;  %v1395_v11 = vadd.f32 %v1394_v53, %v1393_v31 }
 0x3c3   :  { %v1563_v34 = vrot.slane %v1562_v5, 2  ;;  %v2740_v6 = vpop.permute.xlu2 %1180  ;;  %v2742_v30 = vpop.permute.xlu0 %1195  ;;  %v1408_v55 = vrot.slane %v1407_v62, 2  ;;  %v1249_v4 = vperm.slane %v2726_v28, %v2211_v52  ;;  %v1659_v20 = vsel %vm669_vm7, %v1628_v46, %v1658_v19  ;;  %v1301_v19 = vld [vmem:[#allocation2 + $0xe0] sm:$0xff] }
 0x3c4   :  { %v1328_v37 = vmul.f32 %v1296_v58, %v2740_v6  ;;  %v2746_v44 = vpop.permute.xlu1 %1192  ;;  %v1506_v39 = vmul.f32 %v1474_v32, %v2742_v30  ;;  %v1577_v41 = vrot.slane %v1576_v25, 2  ;;  %v1629_v42 = vadd.f32 %v1559_v1, %v1383_v54 }
 0x3c5   :  { %v1564_v23 = vadd.f32 %v1563_v34, %v1562_v5  ;;  %v1330_v61 = vmul.f32 %v1298_v26, %v2746_v44  ;;  %v1300_v5 = vld [vmem:[#allocation2 + $0xd0] sm:$0xff]  ;;  %v1572_v58 = vrot.slane %v1571_v40, 1  ;;  %v1248_v35 = vperm.slane %v2740_v6, %v2206_v10 }
 0x3c6   :  { %v1398_v18 = vsel %vm83_vm0, %v1328_v37, 0.0  ;;  %v1588_v49 = vsel %vm83_vm0, %v1506_v39, 0.0  ;;  %v1409_v29 = vadd.f32 %v1408_v55, %v1407_v62  ;;  %v1578_v32 = vadd.f32 %v1577_v41, %v1576_v25 }
 0x3c7   :  { %v1565_v38 = vrot.slane %v1564_v23, 1  ;;  %v1399_v57 = vrot.slane %v1398_v18, 4  ;;  %v1589_v63 = vrot.slane %v1588_v49, 4  ;;  %v1412_v48 = vsel %vm83_vm0, %v1330_v61, 0.0 }
 0x3c8   :  { %v1660_v7 = vsel %vm671_vm8, %v1629_v42, %v1659_v20  ;;  %v1396_v24 = vrot.slane %v1395_v11, 1  ;;  %v1251_v21 = vperm.slane %v2722_v60, %v2206_v10  ;;  %v1255_v31 = vperm.slane %v2742_v30, %v2211_v52 }
 0x3c9   :  { %v1566_v27 = vadd.f32 %v1565_v38, %v1564_v23  ;;  %v1400_v17 = vadd.f32 %v1399_v57, %v1398_v18  ;;  %v1590_v56 = vadd.f32 %v1589_v63, %v1588_v49  ;;  %v1413_v23 = vrot.slane %v1412_v48, 4 }
 0x3ca   :  { %v1410_v22 = vrot.slane %v1409_v29, 1  ;;  %v1250_v12 = vsel %vm614_vm2, %v1249_v4, %v1248_v35  ;;  %v1254_v18 = vperm.slane %v2746_v44, %v2206_v10  ;;  %v1579_v62 = vrot.slane %v1578_v32, 1 }
 0x3cb   :  { %v1190_v13 = vpop.permute.xlu2 %1189  ;;  %v2760_v3 = vpop.permute.xlu0 %1204  ;;  %v1630_v59 = vadd.f32 %v1566_v27, %v1390_v2  ;;  %v1401_v36 = vrot.slane %v1400_v17, 2  ;;  %v1591_v25 = vrot.slane %v1590_v56, 2  ;;  %v2792_v57 = vadd.f32 %v1572_v58, %v1571_v40 }
 0x3cc   :  { %v2763_v15 = vpop.permute.xlu1 %1201  ;;  %v1505_v9 = vmul.f32 %v1473_v45, %v1190_v13  ;;  %v1332_v0 = vmul.f32 %v1300_v5, %v2760_v3  ;;  %v1252_v39 = vperm.slane %v1190_v13, %v2211_v52  ;;  %v2794_v26 = vadd.f32 %v1396_v24, %v1395_v11  ;;  %v1476_v5 = vld [vmem:[#allocation2 + $0xd8] sm:$0xff] }
 0x3cd   :  { %v1507_v37 = vmul.f32 %v1475_v50, %v2763_v15  ;;  %v1661_v6 = vsel %vm673_vm9, %v1630_v59, %v1660_v7  ;;  %v1402_v60 = vadd.f32 %v1401_v36, %v1400_v17  ;;  %v1276_v44 = vsel %vm661_vm3, %v1250_v12, %v1247_v47  ;;  %v1478_v36 = vld [vmem:[#allocation2 + $0xf8] sm:$0xff] }
 0x3ce   :  { %v1581_v34 = vsel %vm83_vm0, %v1505_v9, 0.0  ;;  %1671 = vst.msk [vmem:[#allocation5] sm:$0xff] %vm83_vm0, %v1661_v6  ;;  %v1426_v30 = vsel %vm83_vm0, %v1332_v0, 0.0  ;;  %v1414_v27 = vadd.f32 %v1413_v23, %v1412_v48  ;;  %v1253_v49 = vsel %vm614_vm2, %v1252_v39, %v1251_v21 }
 0x3cf   :  { %v1582_v28 = vrot.slane %v1581_v34, 4  ;;  %v1595_v43 = vsel %vm83_vm0, %v1507_v37, 0.0  ;;  %v2798_v1 = vadd.f32 %v1410_v22, %v1409_v29  ;;  %v1427_v33 = vrot.slane %v1426_v30, 4 }
 0x3d0   :  { %v1596_v2 = vrot.slane %v1595_v43, 4  ;;  %v2802_v41 = vadd.f32 %v1579_v62, %v1578_v32  ;;  %v1403_v40 = vrot.slane %v1402_v60, 1  ;;  %v2804_v61 = vadd.f32 %v1591_v25, %v1590_v56 }
 0x3d1   :  { %v1583_v8 = vadd.f32 %v1582_v28, %v1581_v34  ;;  %v1256_v13 = vsel %vm614_vm2, %v1255_v31, %v1254_v18  ;;  %v1277_v46 = vsel %vm663_vm4, %v1253_v49, %v1276_v44  ;;  %v1415_v47 = vrot.slane %v1414_v27, 2 }
 0x3d2   :  { %v1260_v11 = vperm.slane %v2760_v3, %v2206_v10  ;;  %v1258_v59 = vperm.slane %v2763_v15, %v2211_v52  ;;  %v1597_v9 = vadd.f32 %v1596_v2, %v1595_v43  ;;  %v1428_v58 = vadd.f32 %v1427_v33, %v1426_v30 }
 0x3d3   :  { %v1199_v38 = vpop.permute.xlu2 %1198  ;;  %v2788_v54 = vpop.permute.xlu0 %1213  ;;  %v1584_v42 = vrot.slane %v1583_v8, 2  ;;  %v1404_v29 = vadd.f32 %v1403_v40, %v1402_v60  ;;  %v1593_v32 = vrot.slane %v2804_v61, 1  ;;  %v1278_v48 = vsel %vm665_vm5, %v1256_v13, %v1277_v46 }
 0x3d4   :  { %v2790_v14 = vpop.permute.xlu1 %1210  ;;  %v1331_v53 = vmul.f32 %v1299_v16, %v1199_v38  ;;  %v1509_v55 = vmul.f32 %v1477_v51, %v2788_v54  ;;  %v1257_v34 = vperm.slane %v1199_v38, %v2206_v10  ;;  %v1416_v24 = vadd.f32 %v1415_v47, %v1414_v27 }
 0x3d5   :  { %v1333_v50 = vmul.f32 %v1301_v19, %v2790_v14  ;;  %v1585_v56 = vadd.f32 %v1584_v42, %v1583_v8  ;;  %v1598_v28 = vrot.slane %v1597_v9, 2  ;;  %v1429_v21 = vrot.slane %v1428_v58, 2 }
 0x3d6   :  { %v1419_v45 = vsel %vm83_vm0, %v1331_v53, 0.0  ;;  %v1609_v63 = vsel %vm83_vm0, %v1509_v55, 0.0  ;;  %v1259_v16 = vsel %vm614_vm2, %v1258_v59, %v1257_v34  ;;  %v1264_v22 = vperm.slane %v2788_v54, %v2211_v52  ;;  %v1302_v53 = vld [vmem:[#allocation2 + $0xf0] sm:$0xff] }
 0x3d7   :  { %v1420_v17 = vrot.slane %v1419_v45, 4  ;;  %v1610_v35 = vrot.slane %v1609_v63, 4  ;;  %v1433_v15 = vsel %vm83_vm0, %v1333_v50, 0.0  ;;  %v1586_v43 = vrot.slane %v1585_v56, 1 }
 0x3d8   :  { %v1434_v6 = vrot.slane %v1433_v15, 4  ;;  %v1263_v38 = vperm.slane %v2790_v14, %v2206_v10  ;;  %v1599_v25 = vadd.f32 %v1598_v28, %v1597_v9  ;;  %v1417_v44 = vrot.slane %v1416_v24, 1 }
 0x3d9   :  { %v1421_v4 = vadd.f32 %v1420_v17, %v1419_v45  ;;  %v1611_v31 = vadd.f32 %v1610_v35, %v1609_v63  ;;  %v1430_v27 = vadd.f32 %v1429_v21, %v1428_v58  ;;  %v1279_v49 = vsel %vm667_vm6, %v1259_v16, %v1278_v48 }
 0x3da   :  { %v1435_v12 = vadd.f32 %v1434_v6, %v1433_v15  ;;  %v1265_v40 = vsel %vm614_vm2, %v1264_v22, %v1263_v38  ;;  %v1587_v42 = vadd.f32 %v1586_v43, %v1585_v56  ;;  %v1600_v17 = vrot.slane %v1599_v25, 1 }
 0x3db   :  { %v1208_v20 = vpop.permute.xlu2 %1207  ;;  %v1422_v37 = vrot.slane %v1421_v4, 2  ;;  %v1612_v54 = vrot.slane %v1611_v31, 2  ;;  %v1431_v50 = vrot.slane %v1430_v27, 1  ;;  %v1631_v48 = vadd.f32 %v2792_v57, %v2794_v26 }
 0x3dc   :  { %v1220_v3 = vpop.permute.xlu1 %1219  ;;  %v1261_v0 = vperm.slane %v1208_v20, %v2211_v52  ;;  %v1508_v7 = vmul.f32 %v1476_v5, %v1208_v20  ;;  %v1436_v33 = vrot.slane %v1435_v12, 2  ;;  %v1594_v34 = vadd.f32 %v1593_v32, %v2804_v61 }
 0x3dd   :  { %v1510_v39 = vmul.f32 %v1478_v36, %v1220_v3  ;;  %v1423_v30 = vadd.f32 %v1422_v37, %v1421_v4  ;;  %v1267_v13 = vperm.slane %v1220_v3, %v2211_v52  ;;  %v1613_v58 = vadd.f32 %v1612_v54, %v1611_v31 }
 0x3de   :  { %v1602_v23 = vsel %vm83_vm0, %v1508_v7, 0.0  ;;  %v1262_v62 = vsel %vm614_vm2, %v1261_v0, %v1260_v11  ;;  %v1437_v4 = vadd.f32 %v1436_v33, %v1435_v12  ;;  %v1633_v36 = vadd.f32 %v1587_v42, %v2798_v1 }
 0x3df   :  { %v1603_v18 = vrot.slane %v1602_v23, 4  ;;  %v1616_v60 = vsel %vm83_vm0, %v1510_v39, 0.0  ;;  %v1280_v45 = vsel %vm669_vm7, %v1262_v62, %v1279_v49  ;;  %v1424_v63 = vrot.slane %v1423_v30, 1 }
 0x3e0   :  { %v1617_v8 = vrot.slane %v1616_v60, 4  ;;  %v1281_v59 = vsel %vm671_vm8, %v1265_v40, %v1280_v45  ;;  %v1418_v56 = vadd.f32 %v1417_v44, %v1416_v24  ;;  %v1601_v0 = vadd.f32 %v1600_v17, %v1599_v25 }
 0x3e1   :  { %v1604_v51 = vadd.f32 %v1603_v18, %v1602_v23  ;;  %v1425_v3 = vadd.f32 %v1424_v63, %v1423_v30  ;;  %v1614_v7 = vrot.slane %v1613_v58, 1  ;;  %v1438_v28 = vrot.slane %v1437_v4, 1 }
 0x3e2   :  { %v1618_v14 = vadd.f32 %v1617_v8, %v1616_v60  ;;  %v1432_v26 = vadd.f32 %v1431_v50, %v1430_v27  ;;  %v1634_v1 = vadd.f32 %v1594_v34, %v1418_v56 }
 0x3e3   :  { %v1217_v2 = vpop.permute.xlu2 %1216  ;;  %v1605_v55 = vrot.slane %v1604_v51, 2  ;;  %v1635_v32 = vadd.f32 %v1601_v0, %v1425_v3  ;;  %v1615_v23 = vadd.f32 %v1614_v7, %v1613_v58  ;;  %v1439_v39 = vadd.f32 %v1438_v28, %v1437_v4 }
 0x3e4   :  { %v1266_v19 = vperm.slane %v1217_v2, %v2206_v10  ;;  %v1334_v46 = vmul.f32 %v1302_v53, %v1217_v2  ;;  %v1619_v11 = vrot.slane %v1618_v14, 2  ;;  %v1632_v10 = vadd.f32 %v2802_v41, %v1404_v29 }
 0x3e5   :  { %v1606_v47 = vadd.f32 %v1605_v55, %v1604_v51  ;;  %v1637_v38 = vadd.f32 %v1615_v23, %v1439_v39 }
 0x3e6   :  { %v1268_v9 = vsel %vm614_vm2, %v1267_v13, %v1266_v19  ;;  %v1440_v5 = vsel %vm83_vm0, %v1334_v46, 0.0  ;;  %v1620_v29 = vadd.f32 %v1619_v11, %v1618_v14  ;;  %v1662_v57 = vsel %vm661_vm3, %v1632_v10, %v1631_v48 }
 0x3e7   :  { %v1607_v35 = vrot.slane %v1606_v47, 1  ;;  %v1282_v52 = vsel %vm673_vm9, %v1268_v9, %v1281_v59  ;;  %v1441_v20 = vrot.slane %v1440_v5, 4  ;;  %v1663_v61 = vsel %vm663_vm4, %v1633_v36, %v1662_v57 }
 0x3e8   :  { %1286 = vst.msk [vmem:[#allocation6 + $0x8] sm:$0xff] %vm684_vm10, %v1282_v52  ;;  %v1621_v21 = vrot.slane %v1620_v29, 1  ;;  %v1664_v16 = vsel %vm665_vm5, %v1634_v1, %v1663_v61 }
 0x3e9   :  { %1698 = dma.vmem_to_hbm [thread:$0]  %s1691_s5, 256, %s1693_s16, [#allocation7], %s1926_s29, %s1926_s29, %s1927_s30   ;;  %v1608_v41 = vadd.f32 %v1607_v35, %v1606_v47  ;;  %v1442_v15 = vadd.f32 %v1441_v20, %v1440_v5  ;;  %v1665_v22 = vsel %vm667_vm6, %v1635_v32, %v1664_v16 }
 0x3ea   :  { %v1622_v12 = vadd.f32 %v1621_v21, %v1620_v29 }
 0x3eb   :  { %v1443_v37 = vrot.slane %v1442_v15, 2  ;;  %v1636_v6 = vadd.f32 %v1608_v41, %v1432_v26 }
 0x3ed   :  { %v1444_v31 = vadd.f32 %v1443_v37, %v1442_v15  ;;  %v1666_v43 = vsel %vm669_vm7, %v1636_v6, %v1665_v22 }
 0x3ee   :  { %v1667_v60 = vsel %vm671_vm8, %v1637_v38, %v1666_v43 }
 0x3ef   :  { %v1445_v24 = vrot.slane %v1444_v31, 1 }
 0x3f1   :  { %v1446_v18 = vadd.f32 %v1445_v24, %v1444_v31 }
 0x3f3   :  { %v1638_v62 = vadd.f32 %v1622_v12, %v1446_v18 }
 0x3f5   :  { %v1668_v25 = vsel %vm673_vm9, %v1638_v62, %v1667_v60 }
 0x3f6   :  { %1672 = vst.msk [vmem:[#allocation5 + $0x8] sm:$0xff] %vm83_vm0, %v1668_v25 }
 0x3f7   :  { %1685 = dma.vmem_to_hbm [thread:$0]  %s1678_s17, 256, %s1680_s20, [#allocation4], %s1926_s29, %s1926_s29, %s1927_s30  }
 0x3f8   :  { %1921 = dma.done.wait [#allocation4], 256  }
 0x3f9   :  { %1922 = vsyncadd [#allocation4], 4294967040 }
 0x3fa   :  { %1923 = dma.done.wait [#allocation7], 256  }
 0x3fb   :  { %1924 = vsyncadd [#allocation7], 4294967040 }
 0x3fc   :  { %1707 = vsyncpa [#allocation3], 1 }
 0x3fd   :  { %1708 = vsyncpa [#allocation4], 1 }
 0x3fe   :  { %1709 = vsyncpa [#allocation7], 1 }

</bundles_post_ra>
